<compile_context>
chip_gen: v7x
topology: tpu7x:2x2x1
jax: 0.10.0
libtpu: 0.0.40
codegen_flags: <defaults>
</compile_context>

<pallas_src>
import math
from functools import lru_cache, partial

import jax
import jax.numpy as jnp
from jax.experimental import pallas as pl
from jax.experimental.pallas import tpu as pltpu

resnet152_config = [(64, 7, 2), 'MP', ['B', 3, False], ['B', 8, True],
                    ['B', 36, True], ['B', 3, True], 'AP', 'F', ['L', 2048, 2]]

_EPS = 1e-5            # nn.BatchNorm2d default eps
_NEG_SLOPE = 0.1       # nn.LeakyReLU(0.1)
_ACT_DTYPE = jnp.bfloat16   # inter-layer activation dtype


# --------------------------------------------------------------------------
# Small helpers
# --------------------------------------------------------------------------

def _round_up(x, m):
    return ((x + m - 1) // m) * m


def _choose_tile(size, align, max_tile):
    """(padded_size, tile) with tile % align == 0 and padded % tile == 0."""
    size_a = _round_up(size, align)
    if size_a <= max_tile:
        return size_a, size_a
    best_t, best_p = align, _round_up(size, align)
    t = 2 * align
    while t <= max_tile:
        p = _round_up(size, t)
        if p <= best_p:
            best_t, best_p = t, p
        t += align
    return best_p, best_t


@lru_cache(maxsize=None)
def _vmem_limit_bytes():
    cap = 64 * 1024 * 1024
    try:
        cap = int(pltpu.get_tpu_info().vmem_capacity_bytes)
    except Exception:
        pass
    return min(3 * cap // 4, 96 * 1024 * 1024)


# --------------------------------------------------------------------------
# Pallas kernels
# --------------------------------------------------------------------------

def _bn_leaky(y, g, b, m_true):
    """BatchNorm (batch statistics over the first m_true rows) + LeakyReLU(0.1).

    Padded rows of `y` are exactly zero (zero-padded A rows), so the plain sum /
    m_true is the correct mean; variance uses a centered, row-masked sum."""
    inv_m = 1.0 / float(m_true)
    mean = jnp.sum(y, axis=0, keepdims=True) * inv_m
    rows = jax.lax.broadcasted_iota(jnp.int32, y.shape, 0)
    mask = (rows < m_true).astype(jnp.float32)
    d = (y - mean) * mask
    var = jnp.sum(d * d, axis=0, keepdims=True) * inv_m
    scale = g * jax.lax.rsqrt(var + _EPS)
    shift = b - mean * scale
    z = y * scale + shift
    return jnp.where(z >= 0, z, _NEG_SLOPE * z)


def _conv_bn_act_kernel(a_ref, w_ref, g_ref, b_ref, o_ref, *, m_true):
    """Fused im2col-matmul -> BatchNorm(batch stats) -> LeakyReLU; bf16 out."""
    y = jnp.dot(a_ref[...], w_ref[...], preferred_element_type=jnp.float32)
    act = _bn_leaky(y, g_ref[...], b_ref[...], m_true)
    o_ref[...] = act.astype(o_ref.dtype)


def _conv_bn_act_res_kernel(a_ref, w_ref, g_ref, b_ref, r_ref, o_ref, *, m_true):
    """Same as above + fused residual add (x = layer(x) + x, no post-activation)."""
    y = jnp.dot(a_ref[...], w_ref[...], preferred_element_type=jnp.float32)
    act = _bn_leaky(y, g_ref[...], b_ref[...], m_true)
    o_ref[...] = (act + r_ref[...].astype(jnp.float32)).astype(o_ref.dtype)


def _maxpool_kernel(p_ref, o_ref):
    # p_ref: (K*K, TM, C) window slabs; max-reduce over the tap axis.
    o_ref[...] = jnp.max(p_ref[...], axis=0)


def _head_kernel(x_ref, w_ref, b_ref, o_ref):
    """AdaptiveAvgPool(1,1) + Flatten + Linear + Softmax(dim=1) in one kernel."""
    hw = x_ref.shape[1]
    pooled = jnp.sum(x_ref[...].astype(jnp.float32), axis=1) * (1.0 / hw)
    y = jnp.dot(pooled.astype(jnp.bfloat16), w_ref[...],
                preferred_element_type=jnp.float32) + b_ref[...]
    m = jnp.max(y, axis=1, keepdims=True)
    e = jnp.exp(y - m)
    o_ref[...] = e / jnp.sum(e, axis=1, keepdims=True)


# --------------------------------------------------------------------------
# pallas_call builders (cached per unique static shape)
# --------------------------------------------------------------------------

@lru_cache(maxsize=None)
def _make_conv_bn_act(Mp, Kp, Np, TN, m_true, residual):
    kernel = partial(_conv_bn_act_res_kernel if residual else _conv_bn_act_kernel,
                     m_true=int(m_true))
    in_specs = [pl.BlockSpec((Mp, Kp), lambda j: (0, 0)),   # A: constant block,
                pl.BlockSpec((Kp, TN), lambda j: (0, j)),   #    fetched once
                pl.BlockSpec((1, TN), lambda j: (0, j)),
                pl.BlockSpec((1, TN), lambda j: (0, j))]
    if residual:
        in_specs.append(pl.BlockSpec((Mp, TN), lambda j: (0, j)))
    return pl.pallas_call(
        kernel,
        out_shape=jax.ShapeDtypeStruct((Mp, Np), _ACT_DTYPE),
        grid=(Np // TN,),
        in_specs=in_specs,
        out_specs=pl.BlockSpec((Mp, TN), lambda j: (0, j)),
        compiler_params=pltpu.CompilerParams(
            dimension_semantics=("parallel",),
            vmem_limit_bytes=_vmem_limit_bytes()),
    )


@lru_cache(maxsize=None)
def _make_maxpool(KK, Mp, C, TM):
    return pl.pallas_call(
        _maxpool_kernel,
        out_shape=jax.ShapeDtypeStruct((Mp, C), _ACT_DTYPE),
        grid=(Mp // TM,),
        in_specs=[pl.BlockSpec((KK, TM, C), lambda i: (0, i, 0))],
        out_specs=pl.BlockSpec((TM, C), lambda i: (i, 0)),
        compiler_params=pltpu.CompilerParams(
            dimension_semantics=("parallel",),
            vmem_limit_bytes=_vmem_limit_bytes()),
    )


@lru_cache(maxsize=None)
def _make_head(N, HW, C, Np):
    return pl.pallas_call(
        _head_kernel,
        out_shape=jax.ShapeDtypeStruct((N, Np), jnp.float32),
        grid=(1,),
        in_specs=[pl.BlockSpec((N, HW, C), lambda i: (0, 0, 0)),
                  pl.BlockSpec((C, Np), lambda i: (0, 0)),
                  pl.BlockSpec((1, Np), lambda i: (0, 0))],
        out_specs=pl.BlockSpec((N, Np), lambda i: (0, 0)),
        compiler_params=pltpu.CompilerParams(
            dimension_semantics=("arbitrary",),
            vmem_limit_bytes=_vmem_limit_bytes()),
    )


# --------------------------------------------------------------------------
# Plain-JAX glue: im2col patch extraction (NHWC) -- fused under per-block jit
# --------------------------------------------------------------------------

def _extract_patch_slabs(x, kh, kw, stride, pad, pad_value=0.0):
    """Returns kh*kw slabs, each (N*Ho*Wo, C), plus (Ho, Wo)."""
    N, H, W, C = x.shape
    Ho = (H + 2 * pad - kh) // stride + 1
    Wo = (W + 2 * pad - kw) // stride + 1
    if pad > 0:
        x = jnp.pad(x, ((0, 0), (pad, pad), (pad, pad), (0, 0)),
                    constant_values=pad_value)
    slabs = []
    for i in range(kh):
        for j in range(kw):
            s = x[:, i:i + stride * (Ho - 1) + 1:stride,
                  j:j + stride * (Wo - 1) + 1:stride, :]
            slabs.append(s.reshape(N * Ho * Wo, C))
    return slabs, Ho, Wo


def _conv_bn_leaky_impl(x, p, spec, residual=None):
    """CNNBlock: Conv2d(bias=False) -> BatchNorm2d (batch stats) -> LeakyReLU(0.1),
    optionally fused with the residual add of ResidualBlock."""
    k, stride, pad, cout = spec
    N, H, W, C = x.shape
    slabs, Ho, Wo = _extract_patch_slabs(x, k, k, stride, pad, pad_value=0.0)
    A = slabs[0] if len(slabs) == 1 else jnp.concatenate(slabs, axis=1)
    A = A.astype(jnp.bfloat16)
    M, K = A.shape
    Kp, Np = p['w'].shape                      # weights pre-padded at build time
    Mp = _round_up(max(M, 8), 16)              # bf16 sublane packing
    assert Mp <= 1024, f"M tile too large for single-tile fused BN: {Mp}"

    A = jnp.pad(A, ((0, Mp - M), (0, Kp - K)))
    TN = 128 if Np <= 256 else 256             # >=2 parallel blocks when Cout>=256

    if residual is None:
        out = _make_conv_bn_act(Mp, Kp, Np, TN, M, False)(
            A, p['w'], p['gamma'], p['beta'])
    else:
        r = residual.reshape(M, cout).astype(_ACT_DTYPE)
        r = jnp.pad(r, ((0, Mp - M), (0, Np - cout)))
        out = _make_conv_bn_act(Mp, Kp, Np, TN, M, True)(
            A, p['w'], p['gamma'], p['beta'], r)

    return out[:M, :cout].reshape(N, Ho, Wo, cout)


# --------------------------------------------------------------------------
# jit'ed layer / block wrappers
# --------------------------------------------------------------------------

@partial(jax.jit, static_argnames=('spec',))
def conv_block(x, p, *, spec):
    return _conv_bn_leaky_impl(x, p, spec)


@partial(jax.jit, static_argnames=('specs', 'use_residual'))
def bottleneck(x, p0, p1, p2, *, specs, use_residual):
    """One repeat of ResidualBlock: 3 CNNBlocks (+ residual when index != 0)."""
    r = x if use_residual else None
    y = _conv_bn_leaky_impl(x, p0, specs[0])
    y = _conv_bn_leaky_impl(y, p1, specs[1])
    return _conv_bn_leaky_impl(y, p2, specs[2], residual=r)


@jax.jit
def maxpool_3x3_s2(x):
    """nn.MaxPool2d(kernel_size=3, stride=2, padding=1)."""
    N, H, W, C = x.shape
    slabs, Ho, Wo = _extract_patch_slabs(x, 3, 3, 2, 1, pad_value=-jnp.inf)
    P = jnp.stack(slabs, axis=0)                       # (9, M, C)
    M = N * Ho * Wo
    Mp, TM = _choose_tile(M, 16, 512)
    P = jnp.pad(P, ((0, 0), (0, Mp - M), (0, 0)))
    y = _make_maxpool(9, Mp, C, TM)(P.astype(_ACT_DTYPE))
    return y[:M].reshape(N, Ho, Wo, C)


@partial(jax.jit, static_argnames=('num_classes',))
def head(x, w, b, *, num_classes):
    """AdaptiveAvgPool2d((1,1)) + Flatten + Linear + Softmax(dim=1), fused."""
    N, H, W, C = x.shape
    xr = x.reshape(N, H * W, C).astype(_ACT_DTYPE)
    probs = _make_head(N, H * W, C, w.shape[1])(xr, w, b)
    return probs[:, :num_classes]


# --------------------------------------------------------------------------
# Parameter construction (deterministic; pre-padded / pre-cast kernel layouts)
# --------------------------------------------------------------------------

def _make_cnnblock_params(key, cin, cout, k):
    # kaiming_normal_: std = sqrt(2 / fan_in), fan_in = cin * k * k
    K = cin * k * k
    Kp = _round_up(K, 128)
    Np = _round_up(cout, 128)
    std = math.sqrt(2.0 / K)
    w = std * jax.random.normal(key, (K, cout), jnp.float32)
    w = jnp.pad(w, ((0, Kp - K), (0, Np - cout))).astype(jnp.bfloat16)
    gamma = jnp.pad(jnp.ones((1, cout), jnp.float32), ((0, 0), (0, Np - cout)))
    beta = jnp.zeros((1, Np), jnp.float32)
    return dict(w=w, gamma=gamma, beta=beta)


def build_resnet152_params(key, in_channels=3, num_classes=20):
    """Returns (plan, params): plan is a static python structure (layer kinds and
    conv attributes), params is an arrays-only pytree (pre-padded layouts)."""
    plan, params = [], []
    c = in_channels
    keys = iter(jax.random.split(key, 512))
    for module in resnet152_config:
        if isinstance(module, tuple):
            cout, k, stride = module
            pad = 3 if k == 7 else (1 if k == 3 else 0)
            plan.append(('conv', (k, stride, pad, cout)))
            params.append(_make_cnnblock_params(next(keys), c, cout, k))
            c = cout
        elif isinstance(module, list):
            if module[0] == 'B':
                num_repeats, downsample = module[1], module[2]
                ch = c
                rep_specs, rep_params = [], []
                for num in range(num_repeats):
                    if downsample:
                        cin0 = ch * 2 if num == 0 else ch * 4
                        s0 = 2 if num == 0 else 1
                    else:
                        cin0 = ch if num == 0 else ch * 4
                        s0 = 1
                    rep_specs.append(((1, s0, 0, ch), (3, 1, 1, ch),
                                      (1, 1, 0, ch * 4)))
                    rep_params.append([
                        _make_cnnblock_params(next(keys), cin0, ch, 1),
                        _make_cnnblock_params(next(keys), ch, ch, 3),
                        _make_cnnblock_params(next(keys), ch, ch * 4, 1),
                    ])
                plan.append(('resblock', tuple(rep_specs)))
                params.append(rep_params)
                c = c * 2
            elif module[0] == 'L':
                in_f = module[1]
                Np = max(128, _round_up(num_classes, 128))
                std = math.sqrt(2.0 / in_f)          # kaiming on Linear weight
                w = std * jax.random.normal(next(keys), (in_f, num_classes),
                                            jnp.float32)
                w = jnp.pad(w, ((0, 0), (0, Np - num_classes))).astype(jnp.bfloat16)
                bound = 1.0 / math.sqrt(in_f)        # default Linear bias init
                b = jax.random.uniform(next(keys), (1, num_classes), jnp.float32,
                                       minval=-bound, maxval=bound)
                b = jnp.pad(b, ((0, 0), (0, Np - num_classes)),
                            constant_values=-1e30)   # padded classes -> softmax 0
                plan.append(('head',))
                params.append(dict(w=w, b=b))
        elif module == 'MP':
            plan.append(('maxpool',)); params.append({})
        elif module == 'AP':
            plan.append(('avgpool',)); params.append({})   # fused into head
        elif module == 'F':
            plan.append(('flatten',)); params.append({})   # fused into head
    return plan, params


# --------------------------------------------------------------------------
# Forward pass
# --------------------------------------------------------------------------

def resnet152_forward(plan, params, x_nchw, num_classes=20):
    # Accept NCHW like PyTorch, compute in NHWC bf16.
    x = jnp.transpose(x_nchw, (0, 2, 3, 1)).astype(_ACT_DTYPE)
    for entry, p in zip(plan, params):
        kind = entry[0]
        if kind == 'conv':
            x = conv_block(x, p, spec=entry[1])
        elif kind == 'resblock':
            for idx, (rspec, rp) in enumerate(zip(entry[1], p)):
                x = bottleneck(x, rp[0], rp[1], rp[2],
                               specs=rspec, use_residual=(idx != 0))
        elif kind == 'maxpool':
            x = maxpool_3x3_s2(x)
        elif kind in ('avgpool', 'flatten'):
            pass                                     # handled inside the head kernel
        elif kind == 'head':
            x = head(x, p['w'], p['b'], num_classes=num_classes)
    return x


if __name__ == "__main__":
    key = jax.random.PRNGKey(0)
    pkey, xkey = jax.random.split(key)
    plan, params = build_resnet152_params(pkey, in_channels=3, num_classes=20)
    x = jax.random.normal(xkey, (2, 3, 32, 32), jnp.float32)   # NCHW like PyTorch
    out = resnet152_forward(plan, params, x)
    out = jax.block_until_ready(out)
    assert out.shape == (2, 20), out.shape
    assert bool(jnp.all(jnp.isfinite(out)))
    # rows should sum to ~1 (softmax)
    assert bool(jnp.all(jnp.abs(jnp.sum(out, axis=1) - 1.0) < 1e-3))
    print("KERNEL_OK")
</pallas_src>

<mosaic_0001>
module attributes {stable_mosaic.version = 11 : i64} {
  func.func @_conv_bn_act_kernel(%arg0: i32, %arg1: memref<512x256xbf16, #tpu.memory_space<vmem>>, %arg2: memref<256x128xbf16, #tpu.memory_space<vmem>>, %arg3: memref<1x128xf32, #tpu.memory_space<vmem>>, %arg4: memref<1x128xf32, #tpu.memory_space<vmem>>, %arg5: memref<512x128xbf16, #tpu.memory_space<vmem>>) attributes {dimension_semantics = [#tpu.dimension_semantics<parallel>], iteration_bounds = array<i64: 1>, scalar_prefetch = 0 : i64, scratch_operands = 0 : i64, tpu.core_type = #tpu.core_type<tc>, window_params = [{pipeline_mode = #tpu.pipeline_mode<synchronous>, transform_indices = @transform_0, window_bounds = array<i64: 512, 256>}, {transform_indices = @transform_1, window_bounds = array<i64: 256, 128>}, {transform_indices = @transform_2, window_bounds = array<i64: 1, 128>}, {transform_indices = @transform_3, window_bounds = array<i64: 1, 128>}, {transform_indices = @transform_4, window_bounds = array<i64: 512, 128>}]} {
    %c0 = arith.constant 0 : index
    %c0_0 = arith.constant 0 : index
    %0 = vector.load %arg1[%c0, %c0_0] : memref<512x256xbf16, #tpu.memory_space<vmem>>, vector<512x256xbf16>
    %c0_1 = arith.constant 0 : index
    %c0_2 = arith.constant 0 : index
    %1 = vector.load %arg2[%c0_1, %c0_2] : memref<256x128xbf16, #tpu.memory_space<vmem>>, vector<256x128xbf16>
    %cst = arith.constant dense<0.000000e+00> : vector<512x128xf32>
    %2 = tpu.matmul %0, %1, %cst {dimension_numbers = #tpu.dot_dimension_numbers<[1], [0], [0], [1], [0, 0, 1, 1], [], []>} : vector<512x256xbf16>, vector<256x128xbf16>, vector<512x128xf32> -> vector<512x128xf32>
    %c0_3 = arith.constant 0 : index
    %c0_4 = arith.constant 0 : index
    %3 = vector.load %arg3[%c0_3, %c0_4] : memref<1x128xf32, #tpu.memory_space<vmem>>, vector<1x128xf32>
    %c0_5 = arith.constant 0 : index
    %c0_6 = arith.constant 0 : index
    %4 = vector.load %arg4[%c0_5, %c0_6] : memref<1x128xf32, #tpu.memory_space<vmem>>, vector<1x128xf32>
    %cst_7 = arith.constant dense<0.000000e+00> : vector<128xf32>
    %5 = vector.multi_reduction <add>, %2, %cst_7 [0] : vector<512x128xf32> to vector<128xf32>
    %6 = vector.shape_cast %5 : vector<128xf32> to vector<1x128xf32>
    %cst_8 = arith.constant 0.001953125 : f32
    %7 = vector.broadcast %cst_8 : f32 to vector<1x128xf32>
    %8 = arith.mulf %6, %7 : vector<1x128xf32>
    %9 = tpu.iota {dimensions = array<i32: 0>} : vector<512x128xi32>
    %c512_i32 = arith.constant 512 : i32
    %10 = vector.broadcast %c512_i32 : i32 to vector<512x128xi32>
    %11 = arith.cmpi slt, %9, %10 : vector<512x128xi32>
    %12 = arith.extui %11 : vector<512x128xi1> to vector<512x128xi32>
    %13 = arith.sitofp %12 : vector<512x128xi32> to vector<512x128xf32>
    %14 = vector.broadcast %8 : vector<1x128xf32> to vector<512x128xf32>
    %15 = arith.subf %2, %14 : vector<512x128xf32>
    %16 = arith.mulf %15, %13 : vector<512x128xf32>
    %17 = arith.mulf %16, %16 : vector<512x128xf32>
    %cst_9 = arith.constant dense<0.000000e+00> : vector<128xf32>
    %18 = vector.multi_reduction <add>, %17, %cst_9 [0] : vector<512x128xf32> to vector<128xf32>
    %19 = vector.shape_cast %18 : vector<128xf32> to vector<1x128xf32>
    %cst_10 = arith.constant 0.001953125 : f32
    %20 = vector.broadcast %cst_10 : f32 to vector<1x128xf32>
    %21 = arith.mulf %19, %20 : vector<1x128xf32>
    %cst_11 = arith.constant 9.99999974E-6 : f32
    %22 = vector.broadcast %cst_11 : f32 to vector<1x128xf32>
    %23 = arith.addf %21, %22 : vector<1x128xf32>
    %24 = math.rsqrt %23 : vector<1x128xf32>
    %25 = arith.mulf %3, %24 : vector<1x128xf32>
    %26 = arith.mulf %8, %25 : vector<1x128xf32>
    %27 = arith.subf %4, %26 : vector<1x128xf32>
    %28 = vector.broadcast %25 : vector<1x128xf32> to vector<512x128xf32>
    %29 = arith.mulf %2, %28 : vector<512x128xf32>
    %30 = vector.broadcast %27 : vector<1x128xf32> to vector<512x128xf32>
    %31 = arith.addf %29, %30 : vector<512x128xf32>
    %cst_12 = arith.constant 0.000000e+00 : f32
    %32 = vector.broadcast %cst_12 : f32 to vector<512x128xf32>
    %33 = arith.cmpf oge, %31, %32 : vector<512x128xf32>
    %cst_13 = arith.constant 1.000000e-01 : f32
    %34 = vector.broadcast %cst_13 : f32 to vector<512x128xf32>
    %35 = arith.mulf %34, %31 : vector<512x128xf32>
    %36 = arith.select %33, %31, %35 : vector<512x128xi1>, vector<512x128xf32>
    %37 = arith.truncf %36 : vector<512x128xf32> to vector<512x128xbf16>
    %c0_14 = arith.constant 0 : index
    %c0_15 = arith.constant 0 : index
    %38 = vector.load %arg5[%c0_14, %c0_15] : memref<512x128xbf16, #tpu.memory_space<vmem>>, vector<512x128xbf16>
    tpu.vector_store %arg5[%c0_14, %c0_15], %37 {strides = array<i32>} : memref<512x128xbf16, #tpu.memory_space<vmem>>, vector<512x128xbf16>,
    return
  }
  func.func @transform_0(%arg0: i32) -> (i32, i32) {
    %c0_i32 = arith.constant 0 : i32
    %c0_i32_0 = arith.constant 0 : i32
    %c0_i32_1 = arith.constant 0 : i32
    return %c0_i32, %c0_i32_0 : i32, i32
  }
  func.func @transform_1(%arg0: i32) -> (i32, i32) {
    %c0_i32 = arith.constant 0 : i32
    %c0_i32_0 = arith.constant 0 : i32
    return %c0_i32, %arg0 : i32, i32
  }
  func.func @transform_2(%arg0: i32) -> (i32, i32) {
    %c0_i32 = arith.constant 0 : i32
    %c0_i32_0 = arith.constant 0 : i32
    return %c0_i32, %arg0 : i32, i32
  }
  func.func @transform_3(%arg0: i32) -> (i32, i32) {
    %c0_i32 = arith.constant 0 : i32
    %c0_i32_0 = arith.constant 0 : i32
    return %c0_i32, %arg0 : i32, i32
  }
  func.func @transform_4(%arg0: i32) -> (i32, i32) {
    %c0_i32 = arith.constant 0 : i32
    %c0_i32_0 = arith.constant 0 : i32
    return %c0_i32, %arg0 : i32, i32
  }
}

</mosaic_0001>

<bundles_post_ra>
// kernel: conv_block.1
= control target key start
LH: loop header
LB: loop body
LE: loop exit
PB: predicated region body
PF: predicated region fallthrough
CT: control target
= control target key end

     0   :  { %v2657_v1 = vmov 0   ;;  %s4326_s0 = inlined_call_operand.vmem [shape: bf16[512,256], index: 0, kind: input, shape index: {}]   ;;  %s4327_s1 = inlined_call_operand.vmem [shape: bf16[256,128], index: 1, kind: input, shape index: {}]   ;;  %s4328_s2 = inlined_call_operand.vmem [shape: f32[1,128], index: 2, kind: input, shape index: {}]   ;;  %s4329_s3 = inlined_call_operand.vmem [shape: f32[1,128], index: 3, kind: input, shape index: {}]   ;;  %s4330_s4 = inlined_call_operand.hbm [shape: bf16[512,128], index: 4, kind: output, shape index: {}]  }
   0x1   :  { %v2519_v0 = vld [vmem:[%s4327_s1] sm:$0xff]   ;;  %531 = vmatprep.subr.bf16.mxu0 %v2657_v1  ;;  %2483 = vmatprep.subr.bf16.mxu1 %v2657_v1  ;;  %v2520_v2 = vld [vmem:[%s4327_s1 + $0x8] sm:$0xff]   ;;  %v2521_v3 = vld [vmem:[%s4327_s1 + $0x10] sm:$0xff]  }
   0x2   :  { %532 = vmatpush1.bf16.msra.mxu0 %v2519_v0  ;;  %2499 = vmatpush1.bf16.msra.mxu1 %v2519_v0  ;;  %v2522_v4 = vld [vmem:[%s4327_s1 + $0x18] sm:$0xff]   ;;  %v2523_v5 = vld [vmem:[%s4327_s1 + $0x20] sm:$0xff]   ;;  %v2524_v7 = vld [vmem:[%s4327_s1 + $0x28] sm:$0xff]  }
   0x3   :  { %533 = vmatprep.subr.bf16.mxu0 %v2657_v1  ;;  %2484 = vmatprep.subr.bf16.mxu1 %v2657_v1  ;;  %v2537_v6 = vld [vmem:[%s4326_s0 + $0x4] ss:$8 sps:$4 sm:$0xff]   ;;  %v2525_v8 = vld [vmem:[%s4327_s1 + $0x30] sm:$0xff]   ;;  %v2526_v9 = vld [vmem:[%s4327_s1 + $0x38] sm:$0xff]  }
   0x4   :  { %563 = vmatprep.mubr.bf16.mxu0 %v2537_v6  ;;  %v2561_v10 = vld [vmem:[%s4326_s0 + $0x104] ss:$8 sps:$4 sm:$0xff]   ;;  %v2529_v13 = vld [vmem:[%s4327_s1 + $0x50] sm:$0xff]   ;;  %v2530_v14 = vld [vmem:[%s4327_s1 + $0x58] sm:$0xff]  }
   0x5   :  { %691 = vmatprep.mubr.bf16.mxu1 %v2561_v10  ;;  %v2527_v11 = vld [vmem:[%s4327_s1 + $0x40] sm:$0xff]   ;;  %v2528_v12 = vld [vmem:[%s4327_s1 + $0x48] sm:$0xff]  }
   0x6   :  { %534 = vmatpush1.bf16.msra.mxu0 %v2520_v2  ;;  %2500 = vmatpush1.bf16.msra.mxu1 %v2520_v2  ;;  %v2531_v15 = vld [vmem:[%s4327_s1 + $0x60] sm:$0xff]   ;;  %v2532_v16 = vld [vmem:[%s4327_s1 + $0x68] sm:$0xff]  }
   0x7   :  { %535 = vmatprep.subr.bf16.mxu0 %v2657_v1  ;;  %2485 = vmatprep.subr.bf16.mxu1 %v2657_v1 }
   0xa   :  { %536 = vmatpush1.bf16.msra.mxu0 %v2521_v3  ;;  %2501 = vmatpush1.bf16.msra.mxu1 %v2521_v3 }
   0xb   :  { %537 = vmatprep.subr.bf16.mxu0 %v2657_v1  ;;  %2486 = vmatprep.subr.bf16.mxu1 %v2657_v1 }
   0xe   :  { %538 = vmatpush1.bf16.msra.mxu0 %v2522_v4  ;;  %2502 = vmatpush1.bf16.msra.mxu1 %v2522_v4 }
   0xf   :  { %539 = vmatprep.subr.bf16.mxu0 %v2657_v1  ;;  %2487 = vmatprep.subr.bf16.mxu1 %v2657_v1 }
  0x12   :  { %540 = vmatpush1.bf16.msra.mxu0 %v2523_v5  ;;  %2503 = vmatpush1.bf16.msra.mxu1 %v2523_v5 }
  0x13   :  { %541 = vmatprep.subr.bf16.mxu0 %v2657_v1  ;;  %2488 = vmatprep.subr.bf16.mxu1 %v2657_v1 }
  0x16   :  { %542 = vmatpush1.bf16.msra.mxu0 %v2524_v7  ;;  %2504 = vmatpush1.bf16.msra.mxu1 %v2524_v7 }
  0x17   :  { %543 = vmatprep.subr.bf16.mxu0 %v2657_v1  ;;  %2489 = vmatprep.subr.bf16.mxu1 %v2657_v1 }
  0x1a   :  { %544 = vmatpush1.bf16.msra.mxu0 %v2525_v8  ;;  %2505 = vmatpush1.bf16.msra.mxu1 %v2525_v8 }
  0x1b   :  { %545 = vmatprep.subr.bf16.mxu0 %v2657_v1  ;;  %2490 = vmatprep.subr.bf16.mxu1 %v2657_v1 }
  0x1e   :  { %546 = vmatpush1.bf16.msra.mxu0 %v2526_v9  ;;  %2506 = vmatpush1.bf16.msra.mxu1 %v2526_v9 }
  0x1f   :  { %547 = vmatprep.subr.bf16.mxu0 %v2657_v1  ;;  %2491 = vmatprep.subr.bf16.mxu1 %v2657_v1 }
  0x22   :  { %548 = vmatpush1.bf16.msra.mxu0 %v2527_v11  ;;  %2507 = vmatpush1.bf16.msra.mxu1 %v2527_v11 }
  0x23   :  { %549 = vmatprep.subr.bf16.mxu0 %v2657_v1  ;;  %2492 = vmatprep.subr.bf16.mxu1 %v2657_v1 }
  0x26   :  { %550 = vmatpush1.bf16.msra.mxu0 %v2528_v12  ;;  %2508 = vmatpush1.bf16.msra.mxu1 %v2528_v12 }
  0x27   :  { %551 = vmatprep.subr.bf16.mxu0 %v2657_v1  ;;  %2493 = vmatprep.subr.bf16.mxu1 %v2657_v1 }
  0x2a   :  { %552 = vmatpush1.bf16.msra.mxu0 %v2529_v13  ;;  %2509 = vmatpush1.bf16.msra.mxu1 %v2529_v13 }
  0x2b   :  { %553 = vmatprep.subr.bf16.mxu0 %v2657_v1  ;;  %2494 = vmatprep.subr.bf16.mxu1 %v2657_v1 }
  0x2e   :  { %554 = vmatpush1.bf16.msra.mxu0 %v2530_v14  ;;  %2510 = vmatpush1.bf16.msra.mxu1 %v2530_v14 }
  0x2f   :  { %555 = vmatprep.subr.bf16.mxu0 %v2657_v1  ;;  %2495 = vmatprep.subr.bf16.mxu1 %v2657_v1 }
  0x32   :  { %556 = vmatpush1.bf16.msra.mxu0 %v2531_v15  ;;  %2511 = vmatpush1.bf16.msra.mxu1 %v2531_v15 }
  0x33   :  { %557 = vmatprep.subr.bf16.mxu0 %v2657_v1  ;;  %2496 = vmatprep.subr.bf16.mxu1 %v2657_v1 }
  0x34   :  { %9 = vsyncpa [#allocation3], 0  ;;  %v2533_v17 = vld [vmem:[%s4327_s1 + $0x70] sm:$0xff]   ;;  %v2534_v18 = vld [vmem:[%s4327_s1 + $0x78] sm:$0xff]  }
  0x35   :  { %v2535_v19 = vld [vmem:[%s4326_s0] ss:$8 sps:$4 sm:$0xff]   ;;  %v2538_v21 = vld [vmem:[%s4326_s0 + $0x14] ss:$8 sps:$4 sm:$0xff]   ;;  %v2540_v23 = vld [vmem:[%s4326_s0 + $0x10] ss:$8 sps:$4 sm:$0xff]  }
  0x36   :  { %558 = vmatpush1.bf16.msra.mxu0 %v2532_v16  ;;  %2512 = vmatpush1.bf16.msra.mxu1 %v2532_v16  ;;  %v2559_v20 = vld [vmem:[%s4326_s0 + $0x100] ss:$8 sps:$4 sm:$0xff]   ;;  %v2565_v22 = vld [vmem:[%s4326_s0 + $0x114] ss:$8 sps:$4 sm:$0xff]   ;;  %v2567_v24 = vld [vmem:[%s4326_s0 + $0x110] ss:$8 sps:$4 sm:$0xff]  }
  0x37   :  { %559 = vmatprep.subr.bf16.mxu0 %v2657_v1  ;;  %2497 = vmatprep.subr.bf16.mxu1 %v2657_v1  ;;  %v2541_v25 = vld [vmem:[%s4326_s0 + $0x24] ss:$8 sps:$4 sm:$0xff]   ;;  %v2543_v27 = vld [vmem:[%s4326_s0 + $0x20] ss:$8 sps:$4 sm:$0xff]   ;;  %v2544_v29 = vld [vmem:[%s4326_s0 + $0x34] ss:$8 sps:$4 sm:$0xff]  }
  0x38   :  { %v2571_v26 = vld [vmem:[%s4326_s0 + $0x124] ss:$8 sps:$4 sm:$0xff]   ;;  %v2573_v28 = vld [vmem:[%s4326_s0 + $0x120] ss:$8 sps:$4 sm:$0xff]   ;;  %v2577_v30 = vld [vmem:[%s4326_s0 + $0x134] ss:$8 sps:$4 sm:$0xff]  }
  0x39   :  { %v2546_v31 = vld [vmem:[%s4326_s0 + $0x30] ss:$8 sps:$4 sm:$0xff]   ;;  %v2547_v33 = vld [vmem:[%s4326_s0 + $0x44] ss:$8 sps:$4 sm:$0xff]   ;;  %v2549_v35 = vld [vmem:[%s4326_s0 + $0x40] ss:$8 sps:$4 sm:$0xff]  }
  0x3a   :  { %560 = vmatpush1.bf16.msra.mxu0 %v2533_v17  ;;  %2513 = vmatpush1.bf16.msra.mxu1 %v2533_v17  ;;  %v2579_v32 = vld [vmem:[%s4326_s0 + $0x130] ss:$8 sps:$4 sm:$0xff]   ;;  %v2583_v34 = vld [vmem:[%s4326_s0 + $0x144] ss:$8 sps:$4 sm:$0xff]   ;;  %v2585_v36 = vld [vmem:[%s4326_s0 + $0x140] ss:$8 sps:$4 sm:$0xff]  }
  0x3b   :  { %561 = vmatprep.subr.bf16.mxu0 %v2657_v1  ;;  %2498 = vmatprep.subr.bf16.mxu1 %v2657_v1  ;;  %v2550_v37 = vld [vmem:[%s4326_s0 + $0x54] ss:$8 sps:$4 sm:$0xff]   ;;  %v2552_v39 = vld [vmem:[%s4326_s0 + $0x50] ss:$8 sps:$4 sm:$0xff]   ;;  %v2553_v41 = vld [vmem:[%s4326_s0 + $0x64] ss:$8 sps:$4 sm:$0xff]  }
  0x3c   :  { %v2589_v38 = vld [vmem:[%s4326_s0 + $0x154] ss:$8 sps:$4 sm:$0xff]   ;;  %v2591_v40 = vld [vmem:[%s4326_s0 + $0x150] ss:$8 sps:$4 sm:$0xff]   ;;  %v2595_v42 = vld [vmem:[%s4326_s0 + $0x164] ss:$8 sps:$4 sm:$0xff]  }
  0x3d   :  { %v2555_v43 = vld [vmem:[%s4326_s0 + $0x60] ss:$8 sps:$4 sm:$0xff]   ;;  %v2556_v45 = vld [vmem:[%s4326_s0 + $0x74] ss:$8 sps:$4 sm:$0xff]   ;;  %v2558_v47 = vld [vmem:[%s4326_s0 + $0x70] ss:$8 sps:$4 sm:$0xff]  }
  0x3e   :  { %562 = vmatpush1.bf16.msra.mxu0 %v2534_v18  ;;  %2514 = vmatpush1.bf16.msra.mxu1 %v2534_v18  ;;  %v2597_v44 = vld [vmem:[%s4326_s0 + $0x160] ss:$8 sps:$4 sm:$0xff]   ;;  %v2601_v46 = vld [vmem:[%s4326_s0 + $0x174] ss:$8 sps:$4 sm:$0xff]   ;;  %v2603_v48 = vld [vmem:[%s4326_s0 + $0x170] ss:$8 sps:$4 sm:$0xff]  }
  0x3f   :  { %v2562_v49 = vld [vmem:[%s4326_s0 + $0x84] ss:$8 sps:$4 sm:$0xff]   ;;  %v2564_v51 = vld [vmem:[%s4326_s0 + $0x80] ss:$8 sps:$4 sm:$0xff]   ;;  %v2568_v53 = vld [vmem:[%s4326_s0 + $0x94] ss:$8 sps:$4 sm:$0xff]  }
  0x40   :  { %v2607_v50 = vld [vmem:[%s4326_s0 + $0x184] ss:$8 sps:$4 sm:$0xff]   ;;  %v2609_v52 = vld [vmem:[%s4326_s0 + $0x180] ss:$8 sps:$4 sm:$0xff]   ;;  %v2610_v54 = vld [vmem:[%s4326_s0 + $0x194] ss:$8 sps:$4 sm:$0xff]  }
  0x41   :  { %564 = vmatmul.mubr.bf16.vlgmr.msra.gmra.mrb[0].mxu0 %v2535_v19  ;;  %692 = vmatmul.mubr.bf16.vlgmr.msra.gmra.mrb[0].mxu1 %v2559_v20  ;;  %v2570_v55 = vld [vmem:[%s4326_s0 + $0x90] ss:$8 sps:$4 sm:$0xff]   ;;  %v2574_v57 = vld [vmem:[%s4326_s0 + $0xa4] ss:$8 sps:$4 sm:$0xff]   ;;  %v2576_v59 = vld [vmem:[%s4326_s0 + $0xa0] ss:$8 sps:$4 sm:$0xff]  }
  0x42   :  { %571 = vmatprep.mubr.bf16.mxu0 %v2538_v21  ;;  %699 = vmatprep.mubr.bf16.mxu1 %v2565_v22  ;;  %v2612_v56 = vld [vmem:[%s4326_s0 + $0x190] ss:$8 sps:$4 sm:$0xff]   ;;  %v2613_v58 = vld [vmem:[%s4326_s0 + $0x1a4] ss:$8 sps:$4 sm:$0xff]   ;;  %v2615_v60 = vld [vmem:[%s4326_s0 + $0x1a0] ss:$8 sps:$4 sm:$0xff]  }
  0x43   :  { %v2580_v61 = vld [vmem:[%s4326_s0 + $0xb4] ss:$8 sps:$4 sm:$0xff]   ;;  %v2582_v63 = vld [vmem:[%s4326_s0 + $0xb0] ss:$8 sps:$4 sm:$0xff]   ;;  %v2586_v1 = vld [vmem:[%s4326_s0 + $0xc4] ss:$8 sps:$4 sm:$0xff]  }
  0x44   :  { %v2616_v62 = vld [vmem:[%s4326_s0 + $0x1b4] ss:$8 sps:$4 sm:$0xff]   ;;  %v2618_v0 = vld [vmem:[%s4326_s0 + $0x1b0] ss:$8 sps:$4 sm:$0xff]   ;;  %v2619_v2 = vld [vmem:[%s4326_s0 + $0x1c4] ss:$8 sps:$4 sm:$0xff]  }
  0x45   :  { %v2588_v3 = vld [vmem:[%s4326_s0 + $0xc0] ss:$8 sps:$4 sm:$0xff]   ;;  %v2592_v5 = vld [vmem:[%s4326_s0 + $0xd4] ss:$8 sps:$4 sm:$0xff]   ;;  %v2594_v7 = vld [vmem:[%s4326_s0 + $0xd0] ss:$8 sps:$4 sm:$0xff]  }
  0x46   :  { %v2621_v4 = vld [vmem:[%s4326_s0 + $0x1c0] ss:$8 sps:$4 sm:$0xff]   ;;  %v2622_v6 = vld [vmem:[%s4326_s0 + $0x1d4] ss:$8 sps:$4 sm:$0xff]   ;;  %v2624_v8 = vld [vmem:[%s4326_s0 + $0x1d0] ss:$8 sps:$4 sm:$0xff]  }
  0x47   :  { %v2598_v9 = vld [vmem:[%s4326_s0 + $0xe4] ss:$8 sps:$4 sm:$0xff]   ;;  %v2600_v11 = vld [vmem:[%s4326_s0 + $0xe0] ss:$8 sps:$4 sm:$0xff]   ;;  %v2604_v13 = vld [vmem:[%s4326_s0 + $0xf4] ss:$8 sps:$4 sm:$0xff]  }
  0x48   :  { %v2625_v10 = vld [vmem:[%s4326_s0 + $0x1e4] ss:$8 sps:$4 sm:$0xff]   ;;  %v2627_v12 = vld [vmem:[%s4326_s0 + $0x1e0] ss:$8 sps:$4 sm:$0xff]   ;;  %v2628_v14 = vld [vmem:[%s4326_s0 + $0x1f4] ss:$8 sps:$4 sm:$0xff]  }
  0x49   :  { %572 = vmatmul.mubr.bf16.gmra.mrb[4].mxu0 %v2540_v23  ;;  %700 = vmatmul.mubr.bf16.gmra.mrb[4].mxu1 %v2567_v24  ;;  %v2606_v15 = vld [vmem:[%s4326_s0 + $0xf0] ss:$8 sps:$4 sm:$0xff]  }
  0x4a   :  { %579 = vmatprep.mubr.bf16.mxu0 %v2541_v25  ;;  %707 = vmatprep.mubr.bf16.mxu1 %v2571_v26  ;;  %v2630_v16 = vld [vmem:[%s4326_s0 + $0x1f0] ss:$8 sps:$4 sm:$0xff]  }
  0x51   :  { %580 = vmatmul.mubr.bf16.gmra.mrb[8].mxu0 %v2543_v27  ;;  %708 = vmatmul.mubr.bf16.gmra.mrb[8].mxu1 %v2573_v28 }
  0x52   :  { %587 = vmatprep.mubr.bf16.mxu0 %v2544_v29  ;;  %715 = vmatprep.mubr.bf16.mxu1 %v2577_v30 }
  0x59   :  { %588 = vmatmul.mubr.bf16.gmra.mrb[12].mxu0 %v2546_v31  ;;  %716 = vmatmul.mubr.bf16.gmra.mrb[12].mxu1 %v2579_v32 }
  0x5a   :  { %595 = vmatprep.mubr.bf16.mxu0 %v2547_v33  ;;  %723 = vmatprep.mubr.bf16.mxu1 %v2583_v34 }
  0x61   :  { %596 = vmatmul.mubr.bf16.gmra.mrb[16].mxu0 %v2549_v35  ;;  %724 = vmatmul.mubr.bf16.gmra.mrb[16].mxu1 %v2585_v36 }
  0x62   :  { %603 = vmatprep.mubr.bf16.mxu0 %v2550_v37  ;;  %731 = vmatprep.mubr.bf16.mxu1 %v2589_v38 }
  0x69   :  { %604 = vmatmul.mubr.bf16.gmra.mrb[20].mxu0 %v2552_v39  ;;  %732 = vmatmul.mubr.bf16.gmra.mrb[20].mxu1 %v2591_v40 }
  0x6a   :  { %611 = vmatprep.mubr.bf16.mxu0 %v2553_v41  ;;  %739 = vmatprep.mubr.bf16.mxu1 %v2595_v42 }
  0x71   :  { %612 = vmatmul.mubr.bf16.gmra.mrb[24].mxu0 %v2555_v43  ;;  %740 = vmatmul.mubr.bf16.gmra.mrb[24].mxu1 %v2597_v44 }
  0x72   :  { %619 = vmatprep.mubr.bf16.mxu0 %v2556_v45  ;;  %747 = vmatprep.mubr.bf16.mxu1 %v2601_v46 }
  0x79   :  { %620 = vmatmul.mubr.bf16.gmra.mrb[28].mxu0 %v2558_v47  ;;  %748 = vmatmul.mubr.bf16.gmra.mrb[28].mxu1 %v2603_v48 }
  0x7a   :  { %627 = vmatprep.mubr.bf16.mxu0 %v2562_v49  ;;  %755 = vmatprep.mubr.bf16.mxu1 %v2607_v50 }
  0x81   :  { %628 = vmatmul.mubr.bf16.gmra.mrb[32].mxu0 %v2564_v51  ;;  %756 = vmatmul.mubr.bf16.gmra.mrb[32].mxu1 %v2609_v52 }
  0x82   :  { %635 = vmatprep.mubr.bf16.mxu0 %v2568_v53  ;;  %763 = vmatprep.mubr.bf16.mxu1 %v2610_v54 }
  0x89   :  { %636 = vmatmul.mubr.bf16.gmra.mrb[36].mxu0 %v2570_v55  ;;  %764 = vmatmul.mubr.bf16.gmra.mrb[36].mxu1 %v2612_v56 }
  0x8a   :  { %643 = vmatprep.mubr.bf16.mxu0 %v2574_v57  ;;  %771 = vmatprep.mubr.bf16.mxu1 %v2613_v58 }
  0x91   :  { %644 = vmatmul.mubr.bf16.gmra.mrb[40].mxu0 %v2576_v59  ;;  %772 = vmatmul.mubr.bf16.gmra.mrb[40].mxu1 %v2615_v60 }
  0x92   :  { %651 = vmatprep.mubr.bf16.mxu0 %v2580_v61  ;;  %779 = vmatprep.mubr.bf16.mxu1 %v2616_v62 }
  0x99   :  { %652 = vmatmul.mubr.bf16.gmra.mrb[44].mxu0 %v2582_v63  ;;  %780 = vmatmul.mubr.bf16.gmra.mrb[44].mxu1 %v2618_v0 }
  0x9a   :  { %659 = vmatprep.mubr.bf16.mxu0 %v2586_v1  ;;  %787 = vmatprep.mubr.bf16.mxu1 %v2619_v2 }
  0xa1   :  { %660 = vmatmul.mubr.bf16.gmra.mrb[48].mxu0 %v2588_v3  ;;  %788 = vmatmul.mubr.bf16.gmra.mrb[48].mxu1 %v2621_v4 }
  0xa2   :  { %667 = vmatprep.mubr.bf16.mxu0 %v2592_v5  ;;  %795 = vmatprep.mubr.bf16.mxu1 %v2622_v6 }
  0xa9   :  { %668 = vmatmul.mubr.bf16.gmra.mrb[52].mxu0 %v2594_v7  ;;  %796 = vmatmul.mubr.bf16.gmra.mrb[52].mxu1 %v2624_v8 }
  0xaa   :  { %675 = vmatprep.mubr.bf16.mxu0 %v2598_v9  ;;  %803 = vmatprep.mubr.bf16.mxu1 %v2625_v10 }
  0xb1   :  { %676 = vmatmul.mubr.bf16.gmra.mrb[56].mxu0 %v2600_v11  ;;  %804 = vmatmul.mubr.bf16.gmra.mrb[56].mxu1 %v2627_v12 }
  0xb2   :  { %683 = vmatprep.mubr.bf16.mxu0 %v2604_v13  ;;  %811 = vmatprep.mubr.bf16.mxu1 %v2628_v14 }
  0xb9   :  { %684 = vmatmul.mubr.bf16.gmra.mrb[60].mxu0 %v2606_v15  ;;  %812 = vmatmul.mubr.bf16.gmra.mrb[60].mxu1 %v2630_v16 }
 0x114   :  { %v2958_v17 = vpop.f32.mrb[0].mxu0  ;;  %v2960_v18 = vpop.f32.mrb[0].mxu1 }
 0x115   :  { %v567_v19 = vpop.f32.mrb[1].mxu0  ;;  %v695_v20 = vpop.f32.mrb[1].mxu1 }
 0x116   :  { %v2962_v21 = vpop.f32.mrb[2].mxu0  ;;  %v2964_v22 = vpop.f32.mrb[2].mxu1 }
 0x117   :  { %v822_v23 = vadd.f32 %v2962_v21, %v2958_v17  ;;  %v570_v24 = vpop.f32.mrb[3].mxu0  ;;  %v698_v25 = vpop.f32.mrb[3].mxu1 }
 0x11c   :  { %v2968_v26 = vpop.f32.mrb[4].mxu0  ;;  %v2970_v27 = vpop.f32.mrb[4].mxu1 }
 0x11d   :  { %4416 = vst [vmem:[#allocation5_spill] sm:$0xff] %v2968_v26  ;;  %v823_v28 = vadd.f32 %v822_v23, %v2968_v26  ;;  %v575_v29 = vpop.f32.mrb[5].mxu0  ;;  %v703_v30 = vpop.f32.mrb[5].mxu1 }
 0x11e   :  { %v2973_v31 = vpop.f32.mrb[6].mxu0  ;;  %v2975_v32 = vpop.f32.mrb[6].mxu1 }
 0x11f   :  { %4417 = vst [vmem:[#allocation6_spill] sm:$0xff] %v2973_v31  ;;  %v824_v33 = vadd.f32 %v823_v28, %v2973_v31  ;;  %v578_v34 = vpop.f32.mrb[7].mxu0  ;;  %v706_v35 = vpop.f32.mrb[7].mxu1 }
 0x124   :  { %v2978_v36 = vpop.f32.mrb[8].mxu0  ;;  %v2980_v37 = vpop.f32.mrb[8].mxu1 }
 0x125   :  { %4418 = vst [vmem:[#allocation7_spill] sm:$0xff] %v2978_v36  ;;  %v825_v38 = vadd.f32 %v824_v33, %v2978_v36  ;;  %v583_v39 = vpop.f32.mrb[9].mxu0  ;;  %v711_v40 = vpop.f32.mrb[9].mxu1 }
 0x126   :  { %v2983_v41 = vpop.f32.mrb[10].mxu0  ;;  %v2985_v42 = vpop.f32.mrb[10].mxu1 }
 0x127   :  { %v826_v43 = vadd.f32 %v825_v38, %v2983_v41  ;;  %v586_v44 = vpop.f32.mrb[11].mxu0  ;;  %v714_v45 = vpop.f32.mrb[11].mxu1 }
 0x12c   :  { %v2988_v46 = vpop.f32.mrb[12].mxu0  ;;  %v2990_v47 = vpop.f32.mrb[12].mxu1 }
 0x12d   :  { %v827_v48 = vadd.f32 %v826_v43, %v2988_v46  ;;  %v591_v49 = vpop.f32.mrb[13].mxu0  ;;  %v719_v50 = vpop.f32.mrb[13].mxu1 }
 0x12e   :  { %v2993_v51 = vpop.f32.mrb[14].mxu0  ;;  %v2995_v52 = vpop.f32.mrb[14].mxu1 }
 0x12f   :  { %v828_v53 = vadd.f32 %v827_v48, %v2993_v51  ;;  %v594_v54 = vpop.f32.mrb[15].mxu0  ;;  %v722_v55 = vpop.f32.mrb[15].mxu1 }
 0x134   :  { %v2998_v56 = vpop.f32.mrb[16].mxu0  ;;  %v3000_v57 = vpop.f32.mrb[16].mxu1 }
 0x135   :  { %v829_v58 = vadd.f32 %v828_v53, %v2998_v56  ;;  %v599_v59 = vpop.f32.mrb[17].mxu0  ;;  %v727_v60 = vpop.f32.mrb[17].mxu1 }
 0x136   :  { %v3003_v61 = vpop.f32.mrb[18].mxu0  ;;  %v3005_v62 = vpop.f32.mrb[18].mxu1 }
 0x137   :  { %v830_v63 = vadd.f32 %v829_v58, %v3003_v61  ;;  %v602_v0 = vpop.f32.mrb[19].mxu0  ;;  %v730_v1 = vpop.f32.mrb[19].mxu1 }
 0x13c   :  { %v3008_v2 = vpop.f32.mrb[20].mxu0  ;;  %v3010_v3 = vpop.f32.mrb[20].mxu1 }
 0x13d   :  { %v831_v4 = vadd.f32 %v830_v63, %v3008_v2  ;;  %v607_v5 = vpop.f32.mrb[21].mxu0  ;;  %v735_v6 = vpop.f32.mrb[21].mxu1 }
 0x13e   :  { %v3013_v7 = vpop.f32.mrb[22].mxu0  ;;  %v3015_v8 = vpop.f32.mrb[22].mxu1 }
 0x13f   :  { %v832_v9 = vadd.f32 %v831_v4, %v3013_v7  ;;  %v610_v10 = vpop.f32.mrb[23].mxu0  ;;  %v738_v11 = vpop.f32.mrb[23].mxu1 }
 0x144   :  { %v3018_v12 = vpop.f32.mrb[24].mxu0  ;;  %v3020_v13 = vpop.f32.mrb[24].mxu1 }
 0x145   :  { %v833_v14 = vadd.f32 %v832_v9, %v3018_v12  ;;  %v615_v15 = vpop.f32.mrb[25].mxu0  ;;  %v743_v16 = vpop.f32.mrb[25].mxu1 }
 0x146   :  { %v3023_v19 = vpop.f32.mrb[26].mxu0  ;;  %v3025_v20 = vpop.f32.mrb[26].mxu1 }
 0x147   :  { %v834_v23 = vadd.f32 %v833_v14, %v3023_v19  ;;  %v618_v24 = vpop.f32.mrb[27].mxu0  ;;  %v746_v25 = vpop.f32.mrb[27].mxu1 }
 0x14c   :  { %v3028_v28 = vpop.f32.mrb[28].mxu0  ;;  %v3030_v29 = vpop.f32.mrb[28].mxu1 }
 0x14d   :  { %v835_v30 = vadd.f32 %v834_v23, %v3028_v28  ;;  %v623_v33 = vpop.f32.mrb[29].mxu0  ;;  %v751_v34 = vpop.f32.mrb[29].mxu1 }
 0x14e   :  { %v3033_v35 = vpop.f32.mrb[30].mxu0  ;;  %v3035_v38 = vpop.f32.mrb[30].mxu1 }
 0x14f   :  { %4419 = vst [vmem:[#allocation8_spill] sm:$0xff] %v3033_v35  ;;  %v836_v39 = vadd.f32 %v835_v30, %v3033_v35  ;;  %v626_v40 = vpop.f32.mrb[31].mxu0  ;;  %v754_v43 = vpop.f32.mrb[31].mxu1 }
 0x154   :  { %v3038_v44 = vpop.f32.mrb[32].mxu0  ;;  %v3040_v45 = vpop.f32.mrb[32].mxu1 }
 0x155   :  { %4420 = vst [vmem:[#allocation9_spill] sm:$0xff] %v3038_v44  ;;  %v837_v48 = vadd.f32 %v836_v39, %v3038_v44  ;;  %v631_v49 = vpop.f32.mrb[33].mxu0  ;;  %v759_v50 = vpop.f32.mrb[33].mxu1 }
 0x156   :  { %v3043_v53 = vpop.f32.mrb[34].mxu0  ;;  %v3045_v54 = vpop.f32.mrb[34].mxu1 }
 0x157   :  { %4421 = vst [vmem:[#allocation10_spill] sm:$0xff] %v3043_v53  ;;  %v838_v55 = vadd.f32 %v837_v48, %v3043_v53  ;;  %v634_v58 = vpop.f32.mrb[35].mxu0  ;;  %v762_v59 = vpop.f32.mrb[35].mxu1 }
 0x15c   :  { %v3048_v60 = vpop.f32.mrb[36].mxu0  ;;  %v3050_v63 = vpop.f32.mrb[36].mxu1 }
 0x15d   :  { %4422 = vst [vmem:[#allocation11_spill] sm:$0xff] %v3048_v60  ;;  %4423 = vst [vmem:[#allocation12_spill] sm:$0xff] %v3050_v63  ;;  %v839_v0 = vadd.f32 %v838_v55, %v3048_v60  ;;  %v639_v1 = vpop.f32.mrb[37].mxu0  ;;  %v767_v4 = vpop.f32.mrb[37].mxu1 }
 0x15e   :  { %v3053_v5 = vpop.f32.mrb[38].mxu0  ;;  %v3055_v6 = vpop.f32.mrb[38].mxu1 }
 0x15f   :  { %4424 = vst [vmem:[#allocation13_spill] sm:$0xff] %v3053_v5  ;;  %4425 = vst [vmem:[#allocation14_spill] sm:$0xff] %v3055_v6  ;;  %v840_v9 = vadd.f32 %v839_v0, %v3053_v5  ;;  %v642_v10 = vpop.f32.mrb[39].mxu0  ;;  %v770_v11 = vpop.f32.mrb[39].mxu1 }
 0x164   :  { %v3058_v14 = vpop.f32.mrb[40].mxu0  ;;  %v3060_v15 = vpop.f32.mrb[40].mxu1 }
 0x165   :  { %4426 = vst [vmem:[#allocation15_spill] sm:$0xff] %v3058_v14  ;;  %4427 = vst [vmem:[#allocation16_spill] sm:$0xff] %v3060_v15  ;;  %v841_v16 = vadd.f32 %v840_v9, %v3058_v14  ;;  %v647_v23 = vpop.f32.mrb[41].mxu0  ;;  %v775_v24 = vpop.f32.mrb[41].mxu1 }
 0x166   :  { %v3063_v25 = vpop.f32.mrb[42].mxu0  ;;  %v3065_v30 = vpop.f32.mrb[42].mxu1 }
 0x167   :  { %4428 = vst [vmem:[#allocation17_spill] sm:$0xff] %v3063_v25  ;;  %v842_v33 = vadd.f32 %v841_v16, %v3063_v25  ;;  %v650_v34 = vpop.f32.mrb[43].mxu0  ;;  %v778_v39 = vpop.f32.mrb[43].mxu1 }
 0x16c   :  { %v3068_v40 = vpop.f32.mrb[44].mxu0  ;;  %v3070_v43 = vpop.f32.mrb[44].mxu1 }
 0x16d   :  { %4429 = vst [vmem:[#allocation18_spill] sm:$0xff] %v3068_v40  ;;  %4430 = vst [vmem:[#allocation19_spill] sm:$0xff] %v3070_v43  ;;  %v843_v48 = vadd.f32 %v842_v33, %v3068_v40  ;;  %v655_v49 = vpop.f32.mrb[45].mxu0  ;;  %v783_v50 = vpop.f32.mrb[45].mxu1 }
 0x16e   :  { %v3073_v55 = vpop.f32.mrb[46].mxu0  ;;  %v3075_v58 = vpop.f32.mrb[46].mxu1 }
 0x16f   :  { %4431 = vst [vmem:[#allocation20_spill] sm:$0xff] %v3073_v55  ;;  %4432 = vst [vmem:[#allocation21_spill] sm:$0xff] %v3075_v58  ;;  %v844_v59 = vadd.f32 %v843_v48, %v3073_v55  ;;  %v658_v0 = vpop.f32.mrb[47].mxu0  ;;  %v786_v1 = vpop.f32.mrb[47].mxu1 }
 0x174   :  { %v3078_v4 = vpop.f32.mrb[48].mxu0  ;;  %v3080_v9 = vpop.f32.mrb[48].mxu1 }
 0x175   :  { %4433 = vst [vmem:[#allocation22_spill] sm:$0xff] %v3078_v4  ;;  %4434 = vst [vmem:[#allocation23_spill] sm:$0xff] %v3080_v9  ;;  %v845_v10 = vadd.f32 %v844_v59, %v3078_v4  ;;  %v663_v11 = vpop.f32.mrb[49].mxu0  ;;  %v791_v16 = vpop.f32.mrb[49].mxu1 }
 0x176   :  { %v3083_v23 = vpop.f32.mrb[50].mxu0  ;;  %v3085_v24 = vpop.f32.mrb[50].mxu1 }
 0x177   :  { %4435 = vst [vmem:[#allocation24_spill] sm:$0xff] %v3083_v23  ;;  %4436 = vst [vmem:[#allocation25_spill] sm:$0xff] %v3085_v24  ;;  %v846_v33 = vadd.f32 %v845_v10, %v3083_v23  ;;  %v666_v34 = vpop.f32.mrb[51].mxu0  ;;  %v794_v39 = vpop.f32.mrb[51].mxu1 }
 0x17c   :  { %v3088_v49 = vpop.f32.mrb[52].mxu0  ;;  %v3090_v48 = vpop.f32.mrb[52].mxu1 }
 0x17d   :  { %4437 = vst [vmem:[#allocation26_spill] sm:$0xff] %v3088_v49  ;;  %4438 = vst [vmem:[#allocation27_spill] sm:$0xff] %v3090_v48  ;;  %v847_v50 = vadd.f32 %v846_v33, %v3088_v49  ;;  %v671_v0 = vpop.f32.mrb[53].mxu0  ;;  %v799_v1 = vpop.f32.mrb[53].mxu1 }
 0x17e   :  { %v3093_v55 = vpop.f32.mrb[54].mxu0  ;;  %v3095_v59 = vpop.f32.mrb[54].mxu1 }
 0x17f   :  { %4439 = vst [vmem:[#allocation28_spill] sm:$0xff] %v3093_v55  ;;  %4440 = vst [vmem:[#allocation29_spill] sm:$0xff] %v3095_v59  ;;  %v848_v11 = vadd.f32 %v847_v50, %v3093_v55  ;;  %v674_v16 = vpop.f32.mrb[55].mxu0  ;;  %v802_v4 = vpop.f32.mrb[55].mxu1 }
 0x184   :  { %v3098_v40 = vpop.f32.mrb[56].mxu0  ;;  %v3100_v10 = vpop.f32.mrb[56].mxu1 }
 0x185   :  { %4441 = vst [vmem:[#allocation30_spill] sm:$0xff] %v3098_v40  ;;  %4442 = vst [vmem:[#allocation31_spill] sm:$0xff] %v3100_v10  ;;  %v849_v34 = vadd.f32 %v848_v11, %v3098_v40  ;;  %v679_v39 = vpop.f32.mrb[57].mxu0  ;;  %v807_v23 = vpop.f32.mrb[57].mxu1 }
 0x186   :  { %v3103_v25 = vpop.f32.mrb[58].mxu0  ;;  %v3105_v33 = vpop.f32.mrb[58].mxu1 }
 0x187   :  { %4443 = vst [vmem:[#allocation32_spill] sm:$0xff] %v3103_v25  ;;  %4444 = vst [vmem:[#allocation33_spill] sm:$0xff] %v3105_v33  ;;  %v850_v0 = vadd.f32 %v849_v34, %v3103_v25  ;;  %v682_v1 = vpop.f32.mrb[59].mxu0  ;;  %v810_v49 = vpop.f32.mrb[59].mxu1 }
 0x18c   :  { %v3108_v14 = vpop.f32.mrb[60].mxu0  ;;  %v3110_v50 = vpop.f32.mrb[60].mxu1 }
 0x18d   :  { %4445 = vst [vmem:[#allocation34_spill] sm:$0xff] %v3108_v14  ;;  %v851_v4 = vadd.f32 %v850_v0, %v3108_v14  ;;  %v687_v16 = vpop.f32.mrb[61].mxu0  ;;  %v815_v55 = vpop.f32.mrb[61].mxu1 }
 0x18e   :  { %v3113_v5 = vpop.f32.mrb[62].mxu0  ;;  %v3115_v11 = vpop.f32.mrb[62].mxu1 }
 0x18f   :  { %v852_v23 = vadd.f32 %v851_v4, %v3113_v5  ;;  %v690_v39 = vpop.f32.mrb[63].mxu0  ;;  %v818_v40 = vpop.f32.mrb[63].mxu1 }
 0x191   :  { %v853_v34 = vadd.f32 %v852_v23, %v2960_v18 }
 0x193   :  { %v854_v49 = vadd.f32 %v853_v34, %v2964_v22 }
 0x195   :  { %v855_v1 = vadd.f32 %v854_v49, %v2970_v27 }
 0x197   :  { %v856_v25 = vadd.f32 %v855_v1, %v2975_v32 }
 0x199   :  { %v857_v0 = vadd.f32 %v856_v25, %v2980_v37 }
 0x19b   :  { %v858_v55 = vadd.f32 %v857_v0, %v2985_v42 }
 0x19d   :  { %v859_v16 = vadd.f32 %v858_v55, %v2990_v47 }
 0x19f   :  { %v860_v14 = vadd.f32 %v859_v16, %v2995_v52 }
 0x1a1   :  { %v861_v4 = vadd.f32 %v860_v14, %v3000_v57 }
 0x1a3   :  { %v862_v40 = vadd.f32 %v861_v4, %v3005_v62 }
 0x1a5   :  { %v863_v23 = vadd.f32 %v862_v40, %v3010_v3 }
 0x1a7   :  { %v864_v39 = vadd.f32 %v863_v23, %v3015_v8 }
 0x1a9   :  { %v865_v34 = vadd.f32 %v864_v39, %v3020_v13 }
 0x1ab   :  { %v866_v49 = vadd.f32 %v865_v34, %v3025_v20 }
 0x1ad   :  { %v867_v25 = vadd.f32 %v866_v49, %v3030_v29 }
 0x1af   :  { %v868_v1 = vadd.f32 %v867_v25, %v3035_v38 }
 0x1b1   :  { %v869_v0 = vadd.f32 %v868_v1, %v3040_v45 }
 0x1b3   :  { %v870_v55 = vadd.f32 %v869_v0, %v3045_v54 }
 0x1b5   :  { %v871_v14 = vadd.f32 %v870_v55, %v3050_v63 }
 0x1b7   :  { %v872_v16 = vadd.f32 %v871_v14, %v3055_v6 }
 0x1b9   :  { %v873_v4 = vadd.f32 %v872_v16, %v3060_v15 }
 0x1bb   :  { %v874_v40 = vadd.f32 %v873_v4, %v3065_v30 }
 0x1bd   :  { %v875_v23 = vadd.f32 %v874_v40, %v3070_v43 }
 0x1bf   :  { %v876_v39 = vadd.f32 %v875_v23, %v3075_v58 }
 0x1c1   :  { %v877_v34 = vadd.f32 %v876_v39, %v3080_v9 }
 0x1c3   :  { %v878_v49 = vadd.f32 %v877_v34, %v3085_v24 }
 0x1c5   :  { %v879_v25 = vadd.f32 %v878_v49, %v3090_v48 }
 0x1c7   :  { %v880_v1 = vadd.f32 %v879_v25, %v3095_v59 }
 0x1c9   :  { %v881_v0 = vadd.f32 %v880_v1, %v3100_v10 }
 0x1cb   :  { %v882_v55 = vadd.f32 %v881_v0, %v3105_v33 }
 0x1cd   :  { %v883_v14 = vadd.f32 %v882_v55, %v3110_v50 }
 0x1cf   :  { %v884_v16 = vadd.f32 %v883_v14, %v3115_v11 }
 0x1d1   :  { %v885_v4 = vrot.slane %v884_v16, 4 }
 0x1d3   :  { %v886_v40 = vadd.f32 %v885_v4, %v884_v16 }
 0x1d5   :  { %v887_v43 = vrot.slane %v886_v40, 2 }
 0x1d7   :  { %v888_v23 = vadd.f32 %v887_v43, %v886_v40 }
 0x1d9   :  { %v889_v58 = vrot.slane %v888_v23, 1 }
 0x1db   :  { %v890_v39 = vadd.f32 %v889_v58, %v888_v23 }
 0x1dd   :  { %v3150_v9 = vmul.f32 0.001953125, %v890_v39 }
 0x1df   :  { %v1149_v34 = vsub.f32 %v2958_v17, %v3150_v9  ;;  %v1150_v49 = vsub.f32 %v2962_v21, %v3150_v9  ;;  %v1151_v25 = vsub.f32 %v2968_v26, %v3150_v9  ;;  %v1152_v55 = vsub.f32 %v2973_v31, %v3150_v9 }
 0x1e0   :  { %v1153_v43 = vsub.f32 %v2978_v36, %v3150_v9  ;;  %v1154_v16 = vsub.f32 %v2983_v41, %v3150_v9  ;;  %v1155_v23 = vsub.f32 %v2988_v46, %v3150_v9  ;;  %v1157_v36 = vsub.f32 %v2998_v56, %v3150_v9 }
 0x1e1   :  { %v1277_v1 = vmul.f32 %v1149_v34, %v1149_v34  ;;  %v1278_v0 = vmul.f32 %v1150_v49, %v1150_v49  ;;  %v1279_v58 = vmul.f32 %v1151_v25, %v1151_v25  ;;  %v1280_v4 = vmul.f32 %v1152_v55, %v1152_v55 }
 0x1e2   :  { %v1281_v39 = vmul.f32 %v1153_v43, %v1153_v43  ;;  %v1156_v34 = vsub.f32 %v2993_v51, %v3150_v9  ;;  %v1282_v49 = vmul.f32 %v1154_v16, %v1154_v16  ;;  %v1283_v25 = vmul.f32 %v1155_v23, %v1155_v23 }
 0x1e3   :  { %v1341_v14 = vadd.f32 %v1278_v0, %v1277_v1  ;;  %v1158_v0 = vsub.f32 %v3003_v61, %v3150_v9  ;;  %v1285_v43 = vmul.f32 %v1157_v36, %v1157_v36 }
 0x1e4   :  { %v1284_v55 = vmul.f32 %v1156_v34, %v1156_v34 }
 0x1e5   :  { %v1342_v40 = vadd.f32 %v1341_v14, %v1279_v58  ;;  %v1159_v14 = vsub.f32 %v3008_v2, %v3150_v9  ;;  %v1286_v16 = vmul.f32 %v1158_v0, %v1158_v0 }
 0x1e7   :  { %v1343_v26 = vadd.f32 %v1342_v40, %v1280_v4  ;;  %v1160_v40 = vsub.f32 %v3013_v7, %v3150_v9  ;;  %v1287_v23 = vmul.f32 %v1159_v14, %v1159_v14 }
 0x1e9   :  { %v1344_v31 = vadd.f32 %v1343_v26, %v1281_v39  ;;  %v1161_v39 = vsub.f32 %v3018_v12, %v3150_v9  ;;  %v1288_v34 = vmul.f32 %v1160_v40, %v1160_v40 }
 0x1eb   :  { %v1345_v1 = vadd.f32 %v1344_v31, %v1282_v49  ;;  %v1162_v49 = vsub.f32 %v3023_v19, %v3150_v9  ;;  %v1289_v36 = vmul.f32 %v1161_v39, %v1161_v39 }
 0x1ed   :  { %v1346_v58 = vadd.f32 %v1345_v1, %v1283_v25  ;;  %v1163_v1 = vsub.f32 %v3028_v28, %v3150_v9  ;;  %v1290_v0 = vmul.f32 %v1162_v49, %v1162_v49 }
 0x1ef   :  { %v1347_v4 = vadd.f32 %v1346_v58, %v1284_v55  ;;  %v1164_v58 = vsub.f32 %v3033_v35, %v3150_v9  ;;  %v1291_v14 = vmul.f32 %v1163_v1, %v1163_v1 }
 0x1f1   :  { %v1348_v26 = vadd.f32 %v1347_v4, %v1285_v43  ;;  %v1165_v4 = vsub.f32 %v3038_v44, %v3150_v9  ;;  %v1292_v40 = vmul.f32 %v1164_v58, %v1164_v58 }
 0x1f3   :  { %v1349_v31 = vadd.f32 %v1348_v26, %v1286_v16  ;;  %v1166_v26 = vsub.f32 %v3043_v53, %v3150_v9  ;;  %v1293_v39 = vmul.f32 %v1165_v4, %v1165_v4 }
 0x1f5   :  { %v1350_v25 = vadd.f32 %v1349_v31, %v1287_v23  ;;  %v1167_v31 = vsub.f32 %v3048_v60, %v3150_v9  ;;  %v1294_v49 = vmul.f32 %v1166_v26, %v1166_v26 }
 0x1f7   :  { %v1351_v55 = vadd.f32 %v1350_v25, %v1288_v34  ;;  %v4446_v25 = vld [vmem:[#allocation13_spill] sm:$0xff]  ;;  %v1295_v1 = vmul.f32 %v1167_v31, %v1167_v31 }
 0x1f8   :  { %v1168_v35 = vsub.f32 %v4446_v25, %v3150_v9 }
 0x1f9   :  { %v1352_v43 = vadd.f32 %v1351_v55, %v1289_v36  ;;  %v4447_v55 = vld [vmem:[#allocation15_spill] sm:$0xff] }
 0x1fa   :  { %v1169_v44 = vsub.f32 %v4447_v55, %v3150_v9  ;;  %v1296_v58 = vmul.f32 %v1168_v35, %v1168_v35 }
 0x1fb   :  { %v1353_v16 = vadd.f32 %v1352_v43, %v1290_v0  ;;  %v4448_v43 = vld [vmem:[#allocation17_spill] sm:$0xff] }
 0x1fc   :  { %v1170_v53 = vsub.f32 %v4448_v43, %v3150_v9  ;;  %v1297_v4 = vmul.f32 %v1169_v44, %v1169_v44 }
 0x1fd   :  { %v1354_v23 = vadd.f32 %v1353_v16, %v1291_v14  ;;  %v4449_v16 = vld [vmem:[#allocation18_spill] sm:$0xff] }
 0x1fe   :  { %v1171_v60 = vsub.f32 %v4449_v16, %v3150_v9  ;;  %v1298_v26 = vmul.f32 %v1170_v53, %v1170_v53 }
 0x1ff   :  { %v1355_v34 = vadd.f32 %v1354_v23, %v1292_v40  ;;  %v4450_v23 = vld [vmem:[#allocation20_spill] sm:$0xff] }
 0x200   :  { %v1172_v25 = vsub.f32 %v4450_v23, %v3150_v9  ;;  %v1299_v31 = vmul.f32 %v1171_v60, %v1171_v60 }
 0x201   :  { %v1356_v36 = vadd.f32 %v1355_v34, %v1293_v39  ;;  %v4451_v34 = vld [vmem:[#allocation22_spill] sm:$0xff] }
 0x202   :  { %v1173_v55 = vsub.f32 %v4451_v34, %v3150_v9  ;;  %v1300_v35 = vmul.f32 %v1172_v25, %v1172_v25 }
 0x203   :  { %v1357_v0 = vadd.f32 %v1356_v36, %v1294_v49  ;;  %v4452_v36 = vld [vmem:[#allocation24_spill] sm:$0xff] }
 0x204   :  { %v1174_v43 = vsub.f32 %v4452_v36, %v3150_v9  ;;  %v1301_v44 = vmul.f32 %v1173_v55, %v1173_v55 }
 0x205   :  { %v1358_v14 = vadd.f32 %v1357_v0, %v1295_v1  ;;  %v4453_v0 = vld [vmem:[#allocation26_spill] sm:$0xff] }
 0x206   :  { %v1175_v16 = vsub.f32 %v4453_v0, %v3150_v9  ;;  %v1302_v53 = vmul.f32 %v1174_v43, %v1174_v43 }
 0x207   :  { %v1359_v40 = vadd.f32 %v1358_v14, %v1296_v58  ;;  %v4454_v14 = vld [vmem:[#allocation28_spill] sm:$0xff] }
 0x208   :  { %v1176_v23 = vsub.f32 %v4454_v14, %v3150_v9  ;;  %v1303_v60 = vmul.f32 %v1175_v16, %v1175_v16 }
 0x209   :  { %v1360_v39 = vadd.f32 %v1359_v40, %v1297_v4  ;;  %v4455_v40 = vld [vmem:[#allocation30_spill] sm:$0xff] }
 0x20a   :  { %v1177_v34 = vsub.f32 %v4455_v40, %v3150_v9  ;;  %v1304_v25 = vmul.f32 %v1176_v23, %v1176_v23 }
 0x20b   :  { %v1361_v49 = vadd.f32 %v1360_v39, %v1298_v26  ;;  %v4456_v39 = vld [vmem:[#allocation32_spill] sm:$0xff] }
 0x20c   :  { %v1178_v36 = vsub.f32 %v4456_v39, %v3150_v9  ;;  %v1305_v55 = vmul.f32 %v1177_v34, %v1177_v34 }
 0x20d   :  { %v1362_v1 = vadd.f32 %v1361_v49, %v1299_v31  ;;  %v4457_v49 = vld [vmem:[#allocation34_spill] sm:$0xff] }
 0x20e   :  { %v1179_v0 = vsub.f32 %v4457_v49, %v3150_v9  ;;  %v1306_v43 = vmul.f32 %v1178_v36, %v1178_v36 }
 0x20f   :  { %v1363_v58 = vadd.f32 %v1362_v1, %v1300_v35  ;;  %v1180_v1 = vsub.f32 %v3113_v5, %v3150_v9 }
 0x210   :  { %v1307_v16 = vmul.f32 %v1179_v0, %v1179_v0 }
 0x211   :  { %v1364_v4 = vadd.f32 %v1363_v58, %v1301_v44  ;;  %v1181_v58 = vsub.f32 %v2960_v18, %v3150_v9  ;;  %v1308_v23 = vmul.f32 %v1180_v1, %v1180_v1 }
 0x213   :  { %v1365_v26 = vadd.f32 %v1364_v4, %v1302_v53  ;;  %v1182_v4 = vsub.f32 %v2964_v22, %v3150_v9  ;;  %v1309_v34 = vmul.f32 %v1181_v58, %v1181_v58 }
 0x215   :  { %v1366_v31 = vadd.f32 %v1365_v26, %v1303_v60  ;;  %v1183_v26 = vsub.f32 %v2970_v27, %v3150_v9  ;;  %v1310_v36 = vmul.f32 %v1182_v4, %v1182_v4 }
 0x217   :  { %v1367_v35 = vadd.f32 %v1366_v31, %v1304_v25  ;;  %v1184_v31 = vsub.f32 %v2975_v32, %v3150_v9  ;;  %v1311_v0 = vmul.f32 %v1183_v26, %v1183_v26 }
 0x219   :  { %v1368_v44 = vadd.f32 %v1367_v35, %v1305_v55  ;;  %v1185_v35 = vsub.f32 %v2980_v37, %v3150_v9  ;;  %v1312_v1 = vmul.f32 %v1184_v31, %v1184_v31 }
 0x21b   :  { %v1369_v53 = vadd.f32 %v1368_v44, %v1306_v43  ;;  %v1186_v44 = vsub.f32 %v2985_v42, %v3150_v9  ;;  %v1313_v58 = vmul.f32 %v1185_v35, %v1185_v35 }
 0x21d   :  { %v1370_v60 = vadd.f32 %v1369_v53, %v1307_v16  ;;  %v1187_v53 = vsub.f32 %v2990_v47, %v3150_v9  ;;  %v1314_v4 = vmul.f32 %v1186_v44, %v1186_v44 }
 0x21f   :  { %v1371_v25 = vadd.f32 %v1370_v60, %v1308_v23  ;;  %v1188_v60 = vsub.f32 %v2995_v52, %v3150_v9  ;;  %v1315_v26 = vmul.f32 %v1187_v53, %v1187_v53 }
 0x221   :  { %v1372_v55 = vadd.f32 %v1371_v25, %v1309_v34  ;;  %v1189_v25 = vsub.f32 %v3000_v57, %v3150_v9  ;;  %v1316_v31 = vmul.f32 %v1188_v60, %v1188_v60 }
 0x223   :  { %v1373_v43 = vadd.f32 %v1372_v55, %v1310_v36  ;;  %v1190_v55 = vsub.f32 %v3005_v62, %v3150_v9  ;;  %v1317_v35 = vmul.f32 %v1189_v25, %v1189_v25 }
 0x225   :  { %v1374_v16 = vadd.f32 %v1373_v43, %v1311_v0  ;;  %v1191_v43 = vsub.f32 %v3010_v3, %v3150_v9  ;;  %v1318_v44 = vmul.f32 %v1190_v55, %v1190_v55 }
 0x227   :  { %v1375_v23 = vadd.f32 %v1374_v16, %v1312_v1  ;;  %v1192_v16 = vsub.f32 %v3015_v8, %v3150_v9  ;;  %v1319_v53 = vmul.f32 %v1191_v43, %v1191_v43 }
 0x229   :  { %v1376_v34 = vadd.f32 %v1375_v23, %v1313_v58  ;;  %v1193_v23 = vsub.f32 %v3020_v13, %v3150_v9  ;;  %v1320_v60 = vmul.f32 %v1192_v16, %v1192_v16 }
 0x22b   :  { %v1377_v36 = vadd.f32 %v1376_v34, %v1314_v4  ;;  %v1194_v34 = vsub.f32 %v3025_v20, %v3150_v9  ;;  %v1321_v25 = vmul.f32 %v1193_v23, %v1193_v23 }
 0x22d   :  { %v1378_v0 = vadd.f32 %v1377_v36, %v1315_v26  ;;  %v1195_v36 = vsub.f32 %v3030_v29, %v3150_v9  ;;  %v1322_v55 = vmul.f32 %v1194_v34, %v1194_v34 }
 0x22f   :  { %v1379_v1 = vadd.f32 %v1378_v0, %v1316_v31  ;;  %v1196_v0 = vsub.f32 %v3035_v38, %v3150_v9  ;;  %v1323_v43 = vmul.f32 %v1195_v36, %v1195_v36 }
 0x231   :  { %v1380_v58 = vadd.f32 %v1379_v1, %v1317_v35  ;;  %v1197_v1 = vsub.f32 %v3040_v45, %v3150_v9  ;;  %v1324_v16 = vmul.f32 %v1196_v0, %v1196_v0 }
 0x233   :  { %v1381_v4 = vadd.f32 %v1380_v58, %v1318_v44  ;;  %v1198_v58 = vsub.f32 %v3045_v54, %v3150_v9  ;;  %v1325_v23 = vmul.f32 %v1197_v1, %v1197_v1 }
 0x235   :  { %v1382_v26 = vadd.f32 %v1381_v4, %v1319_v53  ;;  %v1199_v4 = vsub.f32 %v3050_v63, %v3150_v9  ;;  %v1326_v34 = vmul.f32 %v1198_v58, %v1198_v58 }
 0x237   :  { %v1383_v31 = vadd.f32 %v1382_v26, %v1320_v60  ;;  %v1200_v26 = vsub.f32 %v3055_v6, %v3150_v9  ;;  %v1327_v36 = vmul.f32 %v1199_v4, %v1199_v4 }
 0x239   :  { %v1384_v35 = vadd.f32 %v1383_v31, %v1321_v25  ;;  %v1201_v31 = vsub.f32 %v3060_v15, %v3150_v9  ;;  %v1328_v0 = vmul.f32 %v1200_v26, %v1200_v26 }
 0x23b   :  { %v1385_v44 = vadd.f32 %v1384_v35, %v1322_v55  ;;  %v1202_v35 = vsub.f32 %v3065_v30, %v3150_v9  ;;  %v1329_v1 = vmul.f32 %v1201_v31, %v1201_v31 }
 0x23d   :  { %v1386_v53 = vadd.f32 %v1385_v44, %v1323_v43  ;;  %v4458_v44 = vld [vmem:[#allocation19_spill] sm:$0xff]  ;;  %v1330_v58 = vmul.f32 %v1202_v35, %v1202_v35 }
 0x23e   :  { %v1203_v63 = vsub.f32 %v4458_v44, %v3150_v9 }
 0x23f   :  { %v1387_v60 = vadd.f32 %v1386_v53, %v1324_v16  ;;  %v4459_v53 = vld [vmem:[#allocation21_spill] sm:$0xff] }
 0x240   :  { %v1204_v6 = vsub.f32 %v4459_v53, %v3150_v9  ;;  %v1331_v4 = vmul.f32 %v1203_v63, %v1203_v63 }
 0x241   :  { %v1388_v25 = vadd.f32 %v1387_v60, %v1325_v23  ;;  %v4460_v60 = vld [vmem:[#allocation23_spill] sm:$0xff] }
 0x242   :  { %v1205_v15 = vsub.f32 %v4460_v60, %v3150_v9  ;;  %v1332_v26 = vmul.f32 %v1204_v6, %v1204_v6 }
 0x243   :  { %v1389_v55 = vadd.f32 %v1388_v25, %v1326_v34  ;;  %v1206_v25 = vsub.f32 %v3085_v24, %v3150_v9 }
 0x244   :  { %v1333_v31 = vmul.f32 %v1205_v15, %v1205_v15 }
 0x245   :  { %v1390_v43 = vadd.f32 %v1389_v55, %v1327_v36  ;;  %v1207_v55 = vsub.f32 %v3090_v48, %v3150_v9  ;;  %v1334_v35 = vmul.f32 %v1206_v25, %v1206_v25 }
 0x247   :  { %v1391_v16 = vadd.f32 %v1390_v43, %v1328_v0  ;;  %v1208_v43 = vsub.f32 %v3095_v59, %v3150_v9  ;;  %v1335_v63 = vmul.f32 %v1207_v55, %v1207_v55 }
 0x249   :  { %v1392_v23 = vadd.f32 %v1391_v16, %v1329_v1  ;;  %v1209_v16 = vsub.f32 %v3100_v10, %v3150_v9  ;;  %v1336_v6 = vmul.f32 %v1208_v43, %v1208_v43 }
 0x24b   :  { %v1393_v34 = vadd.f32 %v1392_v23, %v1330_v58  ;;  %v1210_v23 = vsub.f32 %v3105_v33, %v3150_v9  ;;  %v1337_v15 = vmul.f32 %v1209_v16, %v1209_v16  ;;  %v1417_v16 = vlaneseq }
 0x24d   :  { %v1394_v36 = vadd.f32 %v1393_v34, %v1331_v4  ;;  %v1211_v34 = vsub.f32 %v3110_v50, %v3150_v9  ;;  %v1338_v25 = vmul.f32 %v1210_v23, %v1210_v23  ;;  %v820_v23 = vld [vmem:[%s4328_s2] sm:$0x1]  ;;  %s2658_s2 = smov [#allocation2]  }
 0x24f   :  { %v1395_v0 = vadd.f32 %v1394_v36, %v1332_v26  ;;  %v1212_v36 = vsub.f32 %v3115_v11, %v3150_v9 }
 0x251   :  { %v1396_v1 = vadd.f32 %v1395_v0, %v1333_v31  ;;  %v1339_v0 = vmul.f32 %v1211_v34, %v1211_v34  ;;  %v1340_v10 = vmul.f32 %v1212_v36, %v1212_v36 }
 0x253   :  { %v1397_v58 = vadd.f32 %v1396_v1, %v1334_v35 }
 0x255   :  { %v1398_v4 = vadd.f32 %v1397_v58, %v1335_v63 }
 0x257   :  { %v1399_v26 = vadd.f32 %v1398_v4, %v1336_v6  ;;  %v1418_v6 = vshrl.u32 %v1417_v16, 7  ;;  %v4465_v16 = vld [vmem:[#allocation9_spill] sm:$0xff] }
 0x259   :  { %v1400_v31 = vadd.f32 %v1399_v26, %v1337_v15  ;;  %v1419_v4 = vsub.s32 0, %v1418_v6 }
 0x25b   :  { %v1401_v59 = vadd.f32 %v1400_v31, %v1338_v25  ;;  %v4461_v25 = vld [vmem:[#allocation5_spill] sm:$0xff]  ;;  %v4462_v31 = vld [vmem:[#allocation6_spill] sm:$0xff] }
 0x25d   :  { %v1402_v55 = vadd.f32 %v1401_v59, %v1339_v0  ;;  %v821_v59 = vld [vmem:[%s4329_s3] sm:$0x1]  ;;  %s2073_s3 = sshll.u32 %s2658_s2, 4  ;;  %s4301_s3 = int_to_ptr.vmem [resolvable:$true] %s2073_s3 }
 0x25e   :  { %s2633_s17 = scalar_lea.vmem %s4301_s3, 4096  ;;  %p2638_p1 = scmp.lt.s32.totalorder %s4301_s3, %s4301_s3 }
 0x25f   :  { %v1403_v35 = vadd.f32 %v1402_v55, %v1340_v10  ;;  %p2634_p0 = scmp.ne.s32.totalorder %s4301_s3, %s2633_s17  ;;  %p2639_p2 = scmp.lt.s32.totalorder %s2633_s17, %s2633_s17 }
 0x261   :  { %v1404_v1 = vrot.slane %v1403_v35, 4  ;;  %p2640_p3 = por %p2639_p2, %p2638_p1 }
 0x263   :  { %v1405_v48 = vadd.f32 %v1404_v1, %v1403_v35  ;;  %p2641_p4 = pnand %p2640_p3, %p2634_p0 }
 0x265   :  { %v1406_v33 = vrot.slane %v1405_v48, 2 }
 0x267   :  { %v1407_v43 = vadd.f32 %v1406_v33, %v1405_v48 }
 0x269   :  { %v1408_v63 = vrot.slane %v1407_v43, 1 }
 0x26b   :  { %v1409_v58 = vadd.f32 %v1408_v63, %v1407_v43 }
 0x26d   :  { %v1410_v24 = vmul.f32 0.001953125, %v1409_v58  ;;  %v4464_v58 = vld [vmem:[#allocation8_spill] sm:$0xff] }
 0x26f   :  { %v1411_v60 = vadd.f32 1e-05, %v1410_v24 }
 0x271   :  { %2631 = vrsqrt.f32 %v1411_v60 }
 0x27b   :  { %v2632_v34 = vpop.eup %2631 }
 0x27c   :  { %v1413_v15 = vmul.f32 %v2632_v34, %v820_v23  ;;  %v4466_v23 = vld [vmem:[#allocation10_spill] sm:$0xff]  ;;  %v4467_v34 = vld [vmem:[#allocation11_spill] sm:$0xff] }
 0x27e   :  { %v1414_v48 = vmul.f32 %v1413_v15, %v3150_v9  ;;  %v3287_v10 = vrot.slane %v1413_v15, %v1419_v4  ;;  %v4468_v15 = vld [vmem:[#allocation13_spill] sm:$0xff] }
 0x280   :  { %v1415_v33 = vsub.f32 %v821_v59, %v1414_v48  ;;  %v1484_v24 = vmul.f32 %v3287_v10, %v3110_v50  ;;  %v1485_v60 = vmul.f32 %v3287_v10, %v3115_v11  ;;  %v3295_v26 = vmul.f32 %v3287_v10, %v2958_v17  ;;  %v4463_v50 = vld [vmem:[#allocation7_spill] sm:$0xff] }
 0x281   :  { %v3299_v36 = vmul.f32 %v3287_v10, %v2962_v21  ;;  %v3303_v9 = vmul.f32 %v3287_v10, %v4461_v25  ;;  %v3307_v0 = vmul.f32 %v3287_v10, %v4462_v31  ;;  %v3311_v55 = vmul.f32 %v3287_v10, %v4463_v50  ;;  %v4470_v48 = vld [vmem:[#allocation15_spill] sm:$0xff]  ;;  %v4473_v50 = vld [vmem:[#allocation18_spill] sm:$0xff] }
 0x282   :  { %v3313_v11 = vrot.slane %v1415_v33, %v1419_v4  ;;  %v3317_v17 = vmul.f32 %v3287_v10, %v2983_v41  ;;  %v3321_v21 = vmul.f32 %v3287_v10, %v2988_v46  ;;  %v3325_v35 = vmul.f32 %v3287_v10, %v2993_v51 }
 0x283   :  { %v3329_v1 = vmul.f32 %v3287_v10, %v2998_v56  ;;  %v3333_v43 = vmul.f32 %v3287_v10, %v3003_v61  ;;  %v3337_v41 = vmul.f32 %v3287_v10, %v3008_v2  ;;  %v3341_v46 = vmul.f32 %v3287_v10, %v3013_v7 }
 0x284   :  { %v1554_v63 = vadd.f32 %v3313_v11, %v1484_v24  ;;  %v1555_v51 = vadd.f32 %v3313_v11, %v1485_v60  ;;  %v3347_v56 = vmul.f32 %v3287_v10, %v3018_v12  ;;  %v3351_v61 = vmul.f32 %v3287_v10, %v3023_v19  ;;  %v4472_v24 = vld [vmem:[#allocation17_spill] sm:$0xff] }
 0x285   :  { %v3355_v2 = vmul.f32 %v3287_v10, %v3028_v28  ;;  %v3359_v7 = vmul.f32 %v3287_v10, %v4464_v58  ;;  %v3363_v6 = vmul.f32 %v3287_v10, %v4465_v16  ;;  %v3367_v12 = vmul.f32 %v3287_v10, %v4466_v23  ;;  %v4474_v16 = vld [vmem:[#allocation20_spill] sm:$0xff] }
 0x286   :  { %vm1618_vm0 = vcmp.ge.f32.partialorder %v1554_v63, 0.0  ;;  %vm1619_vm1 = vcmp.ge.f32.partialorder %v1555_v51, 0.0  ;;  %v1682_v19 = vmul.f32 0.1, %v1554_v63  ;;  %v1683_v4 = vmul.f32 0.1, %v1555_v51 }
 0x287   :  { %v3371_v28 = vmul.f32 %v3287_v10, %v4467_v34  ;;  %v3375_v59 = vmul.f32 %v3287_v10, %v4468_v15  ;;  %v3379_v33 = vmul.f32 %v3287_v10, %v4470_v48  ;;  %v3383_v60 = vmul.f32 %v3287_v10, %v4472_v24  ;;  %v4475_v15 = vld [vmem:[#allocation22_spill] sm:$0xff]  ;;  %v4476_v48 = vld [vmem:[#allocation24_spill] sm:$0xff] }
 0x288   :  { %v1746_v25 = vsel %vm1618_vm0, %v1554_v63, %v1682_v19  ;;  %v1747_v31 = vsel %vm1619_vm1, %v1555_v51, %v1683_v4  ;;  %v3387_v58 = vmul.f32 %v3287_v10, %v4473_v50  ;;  %v3391_v23 = vmul.f32 %v3287_v10, %v4474_v16  ;;  %v4477_v24 = vld [vmem:[#allocation26_spill] sm:$0xff] }
 0x289   :  { %4469 = vst [vmem:[#allocation28_spill] sm:$0xff] %v3375_v59  ;;  %4471 = vst [vmem:[#allocation30_spill] sm:$0xff] %v3379_v33  ;;  %v2450_v34 = vpack.c.bf16 %v1747_v31, %v1746_v25  ;;  %v3395_v59 = vmul.f32 %v3287_v10, %v4475_v15  ;;  %v3399_v33 = vmul.f32 %v3287_v10, %v4476_v48  ;;  %v4484_v15 = vld [vmem:[#allocation14_spill] sm:$0xff]  ;;  %v4485_v48 = vld [vmem:[#allocation16_spill] sm:$0xff] }
 0x28a   :  { %v3403_v63 = vmul.f32 %v3287_v10, %v4477_v24  ;;  %v3407_v51 = vmul.f32 %v3287_v10, %v4454_v14  ;;  %v3411_v19 = vmul.f32 %v3287_v10, %v4455_v40  ;;  %v3415_v4 = vmul.f32 %v3287_v10, %v4456_v39  ;;  %v4486_v24 = vld [vmem:[#allocation23_spill] sm:$0xff] }
 0x28b   :  { %v3419_v25 = vmul.f32 %v3287_v10, %v4457_v49  ;;  %2482 = vst [vmem:[#allocation2 + $0xf8] sm:$0xff] %v2450_v34   ;;  %v1453_v31 = vmul.f32 %v3287_v10, %v3113_v5  ;;  %v1454_v14 = vmul.f32 %v3287_v10, %v2960_v18  ;;  %v1455_v50 = vmul.f32 %v3287_v10, %v2964_v22  ;;  %v4483_v34 = vld [vmem:[#allocation12_spill] sm:$0xff] }
 0x28c   :  { %4478 = vst [vmem:[#allocation32_spill] sm:$0xff] %v3403_v63  ;;  %4479 = vst [vmem:[#allocation34_spill] sm:$0xff] %v3407_v51  ;;  %v1456_v40 = vmul.f32 %v3287_v10, %v2970_v27  ;;  %v1457_v39 = vmul.f32 %v3287_v10, %v2975_v32  ;;  %v1458_v49 = vmul.f32 %v3287_v10, %v2980_v37  ;;  %v4490_v51 = vld [vmem:[#allocation31_spill] sm:$0xff]  ;;  %v4491_v63 = vld [vmem:[#allocation33_spill] sm:$0xff] }
 0x28d   :  { %4480 = vst [vmem:[#allocation19_spill] sm:$0xff] %v3411_v19  ;;  %4481 = vst [vmem:[#allocation21_spill] sm:$0xff] %v3415_v4  ;;  %v1459_v16 = vmul.f32 %v3287_v10, %v2985_v42  ;;  %v1460_v5 = vmul.f32 %v3287_v10, %v2990_v47  ;;  %v1461_v18 = vmul.f32 %v3287_v10, %v2995_v52  ;;  %v4488_v4 = vld [vmem:[#allocation27_spill] sm:$0xff]  ;;  %v4489_v19 = vld [vmem:[#allocation29_spill] sm:$0xff] }
 0x28e   :  { %4482 = vst [vmem:[#allocation5_spill] sm:$0xff] %v3419_v25  ;;  %v1462_v22 = vmul.f32 %v3287_v10, %v3000_v57  ;;  %v1463_v27 = vmul.f32 %v3287_v10, %v3005_v62  ;;  %v1464_v32 = vmul.f32 %v3287_v10, %v3010_v3  ;;  %v1465_v37 = vmul.f32 %v3287_v10, %v3015_v8  ;;  %v4487_v25 = vld [vmem:[#allocation25_spill] sm:$0xff] }
 0x28f   :  { %v1466_v42 = vmul.f32 %v3287_v10, %v3020_v13  ;;  %v1467_v47 = vmul.f32 %v3287_v10, %v3025_v20  ;;  %v1468_v52 = vmul.f32 %v3287_v10, %v3030_v29  ;;  %v1469_v57 = vmul.f32 %v3287_v10, %v3035_v38 }
 0x290   :  { %v1470_v62 = vmul.f32 %v3287_v10, %v3040_v45  ;;  %v1471_v3 = vmul.f32 %v3287_v10, %v3045_v54  ;;  %v1472_v8 = vmul.f32 %v3287_v10, %v4483_v34  ;;  %v1473_v13 = vmul.f32 %v3287_v10, %v4484_v15 }
 0x291   :  { %v1474_v20 = vmul.f32 %v3287_v10, %v4485_v48  ;;  %v1475_v29 = vmul.f32 %v3287_v10, %v3065_v30  ;;  %v1476_v38 = vmul.f32 %v3287_v10, %v4458_v44  ;;  %v1477_v45 = vmul.f32 %v3287_v10, %v4459_v53 }
 0x292   :  { %v1478_v54 = vmul.f32 %v3287_v10, %v4486_v24  ;;  %v1479_v34 = vmul.f32 %v3287_v10, %v4487_v25  ;;  %v1480_v15 = vmul.f32 %v3287_v10, %v4488_v4  ;;  %v1481_v48 = vmul.f32 %v3287_v10, %v4489_v19 }
 0x293   :  { %v1482_v30 = vmul.f32 %v3287_v10, %v4490_v51  ;;  %v1483_v44 = vmul.f32 %v3287_v10, %v4491_v63  ;;  %v3485_v53 = vadd.f32 %v3313_v11, %v3295_v26  ;;  %v3489_v24 = vadd.f32 %v3313_v11, %v3299_v36  ;;  %v4494_v63 = vld [vmem:[#allocation30_spill] sm:$0xff] }
 0x294   :  { %v3493_v4 = vadd.f32 %v3313_v11, %v3303_v9  ;;  %v3497_v19 = vadd.f32 %v3313_v11, %v3307_v0  ;;  %v3501_v51 = vadd.f32 %v3313_v11, %v3311_v55  ;;  %v3505_v10 = vadd.f32 %v3313_v11, %v3317_v17 }
 0x295   :  { %v3509_v26 = vadd.f32 %v3313_v11, %v3321_v21  ;;  %v3513_v36 = vadd.f32 %v3313_v11, %v3325_v35  ;;  %v3517_v9 = vadd.f32 %v3313_v11, %v3329_v1  ;;  %v3521_v0 = vadd.f32 %v3313_v11, %v3333_v43 }
 0x296   :  { %v3525_v55 = vadd.f32 %v3313_v11, %v3337_v41  ;;  %v3529_v17 = vadd.f32 %v3313_v11, %v3341_v46  ;;  %v3533_v21 = vadd.f32 %v3313_v11, %v3347_v56  ;;  %v3537_v35 = vadd.f32 %v3313_v11, %v3351_v61  ;;  %v4493_v61 = vld [vmem:[#allocation28_spill] sm:$0xff] }
 0x297   :  { %v3541_v1 = vadd.f32 %v3313_v11, %v3355_v2  ;;  %v3545_v43 = vadd.f32 %v3313_v11, %v3359_v7  ;;  %v3549_v41 = vadd.f32 %v3313_v11, %v3363_v6  ;;  %v3553_v46 = vadd.f32 %v3313_v11, %v3367_v12 }
 0x298   :  { %v3557_v56 = vadd.f32 %v3313_v11, %v3371_v28  ;;  %v3561_v2 = vadd.f32 %v3313_v11, %v4493_v61  ;;  %v3565_v7 = vadd.f32 %v3313_v11, %v4494_v63  ;;  %v3569_v6 = vadd.f32 %v3313_v11, %v3383_v60  ;;  %v4500_v63 = vld [vmem:[#allocation32_spill] sm:$0xff] }
 0x299   :  { %4492 = vst [vmem:[#allocation6_spill] sm:$0xff] %v3549_v41  ;;  %v3573_v12 = vadd.f32 %v3313_v11, %v3387_v58  ;;  %v3577_v28 = vadd.f32 %v3313_v11, %v3391_v23  ;;  %v3581_v25 = vadd.f32 %v3313_v11, %v3395_v59  ;;  %v3585_v61 = vadd.f32 %v3313_v11, %v3399_v33 }
 0x29a   :  { %4495 = vst [vmem:[#allocation7_spill] sm:$0xff] %v3569_v6  ;;  %v3589_v60 = vadd.f32 %v3313_v11, %v4500_v63  ;;  %v4501_v6 = vld [vmem:[#allocation34_spill] sm:$0xff]  ;;  %v3611_v63 = vadd.f32 %v3313_v11, %v1454_v14  ;;  %v3632_v14 = vadd.f32 %v3313_v11, %v1461_v18  ;;  %v3653_v18 = vadd.f32 %v3313_v11, %v1468_v52 }
 0x29b   :  { %4496 = vst [vmem:[#allocation8_spill] sm:$0xff] %v3573_v12  ;;  %4497 = vst [vmem:[#allocation9_spill] sm:$0xff] %v3577_v28  ;;  %v3593_v58 = vadd.f32 %v3313_v11, %v4501_v6  ;;  %v4502_v12 = vld [vmem:[#allocation19_spill] sm:$0xff]  ;;  %v4504_v28 = vld [vmem:[#allocation21_spill] sm:$0xff]  ;;  %v3614_v6 = vadd.f32 %v3313_v11, %v1455_v50  ;;  %v3635_v50 = vadd.f32 %v3313_v11, %v1462_v22  ;;  %vm1556_vm2 = vcmp.ge.f32.partialorder %v3485_v53, 0.0 }
 0x29c   :  { %4498 = vst [vmem:[#allocation10_spill] sm:$0xff] %v3581_v25  ;;  %4499 = vst [vmem:[#allocation11_spill] sm:$0xff] %v3585_v61  ;;  %v3597_v23 = vadd.f32 %v3313_v11, %v4502_v12  ;;  %v3601_v59 = vadd.f32 %v3313_v11, %v4504_v28  ;;  %v4505_v25 = vld [vmem:[#allocation5_spill] sm:$0xff]  ;;  %v3608_v61 = vadd.f32 %v3313_v11, %v1453_v31  ;;  %vm1557_vm3 = vcmp.ge.f32.partialorder %v3489_v24, 0.0 }
 0x29d   :  { %v3605_v33 = vadd.f32 %v3313_v11, %v4505_v25  ;;  %v3617_v12 = vadd.f32 %v3313_v11, %v1456_v40  ;;  %v3623_v28 = vadd.f32 %v3313_v11, %v1458_v49  ;;  %v3626_v25 = vadd.f32 %v3313_v11, %v1459_v16  ;;  %4507 = vst [vmem:[#allocation17_spill] sm:$0xff] %v3653_v18 }
 0x29e   :  { %4503 = vst [vmem:[#allocation13_spill] sm:$0xff] %v3597_v23  ;;  %v3620_v23 = vadd.f32 %v3313_v11, %v1457_v39  ;;  %v3629_v31 = vadd.f32 %v3313_v11, %v1460_v5  ;;  %v3638_v40 = vadd.f32 %v3313_v11, %v1463_v27  ;;  %v3641_v39 = vadd.f32 %v3313_v11, %v1464_v32 }
 0x29f   :  { %v3644_v49 = vadd.f32 %v3313_v11, %v1465_v37  ;;  %v3647_v16 = vadd.f32 %v3313_v11, %v1466_v42  ;;  %v3650_v5 = vadd.f32 %v3313_v11, %v1467_v47  ;;  %v3656_v22 = vadd.f32 %v3313_v11, %v1469_v57 }
 0x2a0   :  { %v3659_v27 = vadd.f32 %v3313_v11, %v1470_v62  ;;  %v3662_v32 = vadd.f32 %v3313_v11, %v1471_v3  ;;  %v3665_v37 = vadd.f32 %v3313_v11, %v1472_v8  ;;  %v3668_v42 = vadd.f32 %v3313_v11, %v1473_v13 }
 0x2a1   :  { %4506 = vst [vmem:[#allocation15_spill] sm:$0xff] %v3650_v5  ;;  %4508 = vst [vmem:[#allocation18_spill] sm:$0xff] %v3656_v22  ;;  %v3671_v47 = vadd.f32 %v3313_v11, %v1474_v20  ;;  %v3674_v52 = vadd.f32 %v3313_v11, %v1475_v29  ;;  %v3677_v57 = vadd.f32 %v3313_v11, %v1476_v38  ;;  %vm1558_vm4 = vcmp.ge.f32.partialorder %v3493_v4, 0.0 }
 0x2a2   :  { %4509 = vst [vmem:[#allocation20_spill] sm:$0xff] %v3659_v27  ;;  %4510 = vst [vmem:[#allocation22_spill] sm:$0xff] %v3662_v32  ;;  %v3680_v62 = vadd.f32 %v3313_v11, %v1477_v45  ;;  %v3683_v3 = vadd.f32 %v3313_v11, %v1478_v54  ;;  %v3686_v8 = vadd.f32 %v3313_v11, %v1479_v34  ;;  %vm1559_vm5 = vcmp.ge.f32.partialorder %v3497_v19, 0.0 }
 0x2a3   :  { %4511 = vst [vmem:[#allocation24_spill] sm:$0xff] %v3665_v37  ;;  %4512 = vst [vmem:[#allocation26_spill] sm:$0xff] %v3668_v42  ;;  %v3689_v13 = vadd.f32 %v3313_v11, %v1480_v15  ;;  %v3692_v20 = vadd.f32 %v3313_v11, %v1481_v48  ;;  %v3695_v29 = vadd.f32 %v3313_v11, %v1482_v30  ;;  %vm1560_vm6 = vcmp.ge.f32.partialorder %v3501_v51, 0.0 }
 0x2a4   :  { %4513 = vst [vmem:[#allocation12_spill] sm:$0xff] %v3671_v47  ;;  %4514 = vst [vmem:[#allocation14_spill] sm:$0xff] %v3674_v52  ;;  %v3698_v38 = vadd.f32 %v3313_v11, %v1483_v44  ;;  %vm1561_vm7 = vcmp.ge.f32.partialorder %v3505_v10, 0.0  ;;  %vm1562_vm8 = vcmp.ge.f32.partialorder %v3509_v26, 0.0  ;;  %vm1563_vm9 = vcmp.ge.f32.partialorder %v3513_v36, 0.0 }
 0x2a5   :  { %4515 = vst [vmem:[#allocation16_spill] sm:$0xff] %v3677_v57  ;;  %4516 = vst [vmem:[#allocation23_spill] sm:$0xff] %v3680_v62  ;;  %vm1564_vm10 = vcmp.ge.f32.partialorder %v3517_v9, 0.0  ;;  %vm1565_vm11 = vcmp.ge.f32.partialorder %v3521_v0, 0.0  ;;  %v1620_v11 = vmul.f32 0.1, %v3485_v53 }
 0x2a6   :  { %4517 = vst [vmem:[#allocation25_spill] sm:$0xff] %v3683_v3  ;;  %4518 = vst [vmem:[#allocation27_spill] sm:$0xff] %v3686_v8  ;;  %vm1566_vm12 = vcmp.ge.f32.partialorder %v3525_v55, 0.0  ;;  %v1621_v45 = vmul.f32 0.1, %v3489_v24  ;;  %vm1567_vm13 = vcmp.ge.f32.partialorder %v3529_v17, 0.0 }
 0x2a7   :  { %4519 = vst [vmem:[#allocation29_spill] sm:$0xff] %v3689_v13  ;;  %4520 = vst [vmem:[#allocation31_spill] sm:$0xff] %v3692_v20  ;;  %v1622_v54 = vmul.f32 0.1, %v3493_v4  ;;  %v1623_v34 = vmul.f32 0.1, %v3497_v19  ;;  %v3722_v44 = vsel %vm1556_vm2, %v3485_v53, %v1620_v11 }
 0x2a8   :  { %4521 = vst [vmem:[#allocation33_spill] sm:$0xff] %v3695_v29  ;;  %4522 = vst [vmem:[#allocation28_spill] sm:$0xff] %v3698_v38  ;;  %v1624_v15 = vmul.f32 0.1, %v3501_v51  ;;  %v1625_v48 = vmul.f32 0.1, %v3505_v10  ;;  %v3731_v13 = vsel %vm1557_vm3, %v3489_v24, %v1621_v45 }
 0x2a9   :  { %v1626_v30 = vmul.f32 0.1, %v3509_v26  ;;  %4523 = vst [vmem:[#allocation30_spill] sm:$0xff] %v3722_v44  ;;  %vm1568_vm14 = vcmp.ge.f32.partialorder %v3533_v21, 0.0  ;;  %v1627_v38 = vmul.f32 0.1, %v3513_v36  ;;  %v3742_v44 = vsel %vm1558_vm4, %v3493_v4, %v1622_v54 }
 0x2aa   :  { %v1628_v29 = vmul.f32 0.1, %v3517_v9  ;;  %v1629_v20 = vmul.f32 0.1, %v3521_v0  ;;  %4524 = vst [vmem:[#allocation32_spill] sm:$0xff] %v3731_v13  ;;  %vm1569_vm15 = vcmp.ge.f32.partialorder %v3537_v35, 0.0  ;;  %v3757_v13 = vsel %vm1559_vm5, %v3497_v19, %v1623_v34 }
 0x2ab   :  { %v1630_v8 = vmul.f32 0.1, %v3525_v55  ;;  %v1631_v53 = vmul.f32 0.1, %v3529_v17  ;;  %v3737_v11 = vmul.f32 0.1, %v3533_v21  ;;  %v3772_v62 = vsel %vm1560_vm6, %v3501_v51, %v1624_v15 }
 0x2ac   :  { %4525 = vst [vmem:[#allocation34_spill] sm:$0xff] %v3742_v44  ;;  %vm1570_vm0 = vcmp.ge.f32.partialorder %v3541_v1, 0.0  ;;  %v3746_v3 = vmul.f32 0.1, %v3537_v35  ;;  %v3749_v24 = vmul.f32 0.1, %v3541_v1 }
 0x2ad   :  { %v3752_v45 = vmul.f32 0.1, %v3545_v43  ;;  %4526 = vst [vmem:[#allocation19_spill] sm:$0xff] %v3757_v13  ;;  %vm1571_vm1 = vcmp.ge.f32.partialorder %v3545_v43, 0.0  ;;  %v3761_v4 = vmul.f32 0.1, %v3549_v41 }
 0x2ae   :  { %v3764_v54 = vmul.f32 0.1, %v3553_v46  ;;  %v3767_v44 = vmul.f32 0.1, %v3557_v56  ;;  %4530 = vst [vmem:[#allocation36_spill] sm:$0xff] %v3772_v62  ;;  %vm1572_vm2 = vcmp.ge.f32.partialorder %v3549_v41, 0.0 }
 0x2af   :  { %4527 = vst [vmem:[#allocation21_spill] sm:$0xff] %v3761_v4  ;;  %v3776_v19 = vmul.f32 0.1, %v3561_v2  ;;  %v3779_v34 = vmul.f32 0.1, %v3565_v7  ;;  %v4532_v13 = vld [vmem:[#allocation7_spill] sm:$0xff] }
 0x2b0   :  { %4528 = vst [vmem:[#allocation5_spill] sm:$0xff] %v3764_v54  ;;  %4529 = vst [vmem:[#allocation35_spill] sm:$0xff] %v3767_v44  ;;  %v3782_v4 = vmul.f32 0.1, %v4532_v13  ;;  %v3787_v44 = vsel %vm1561_vm7, %v3505_v10, %v1625_v48  ;;  %vm1573_vm3 = vcmp.ge.f32.partialorder %v3553_v46, 0.0  ;;  %v4535_v51 = vld [vmem:[#allocation8_spill] sm:$0xff] }
 0x2b1   :  { %4531 = vst [vmem:[#allocation37_spill] sm:$0xff] %v3776_v19  ;;  %4534 = vst [vmem:[#allocation38_spill] sm:$0xff] %v3787_v44  ;;  %v3791_v15 = vmul.f32 0.1, %v4535_v51  ;;  %v4537_v62 = vld [vmem:[#allocation9_spill] sm:$0xff]  ;;  %v4538_v19 = vld [vmem:[#allocation10_spill] sm:$0xff] }
 0x2b2   :  { %4533 = vst [vmem:[#allocation7_spill] sm:$0xff] %v3782_v4  ;;  %v3794_v54 = vmul.f32 0.1, %v4537_v62  ;;  %v3797_v41 = vmul.f32 0.1, %v4538_v19  ;;  %v3802_v4 = vsel %vm1562_vm8, %v3509_v26, %v1626_v30  ;;  %vm1574_vm4 = vcmp.ge.f32.partialorder %v3557_v56, 0.0 }
 0x2b3   :  { %4536 = vst [vmem:[#allocation8_spill] sm:$0xff] %v3791_v15  ;;  %4540 = vst [vmem:[#allocation10_spill] sm:$0xff] %v3802_v4  ;;  %v4541_v10 = vld [vmem:[#allocation11_spill] sm:$0xff]  ;;  %v3809_v44 = vmul.f32 0.1, %v3589_v60  ;;  %vm1575_vm5 = vcmp.ge.f32.partialorder %v3561_v2, 0.0 }
 0x2b4   :  { %4539 = vst [vmem:[#allocation9_spill] sm:$0xff] %v3797_v41  ;;  %v3806_v48 = vmul.f32 0.1, %v4541_v10  ;;  %v3812_v15 = vmul.f32 0.1, %v3593_v58  ;;  %v3817_v41 = vsel %vm1563_vm9, %v3513_v36, %v1627_v38  ;;  %v4544_v26 = vld [vmem:[#allocation13_spill] sm:$0xff]  ;;  %v3834_v36 = vsel %vm1564_vm10, %v3517_v9, %v1628_v29 }
 0x2b5   :  { %4542 = vst [vmem:[#allocation11_spill] sm:$0xff] %v3809_v44  ;;  %4543 = vst [vmem:[#allocation39_spill] sm:$0xff] %v3817_v41  ;;  %v3823_v30 = vmul.f32 0.1, %v4544_v26  ;;  %v3826_v4 = vmul.f32 0.1, %v3601_v59  ;;  %v3852_v9 = vsel %vm1565_vm11, %v3521_v0, %v1629_v20  ;;  %v3870_v0 = vsel %vm1566_vm12, %v3525_v55, %v1630_v8 }
 0x2b6   :  { %v3829_v44 = vmul.f32 0.1, %v3605_v33  ;;  %4546 = vst [vmem:[#allocation40_spill] sm:$0xff] %v3834_v36  ;;  %vm1578_vm8 = vcmp.ge.f32.partialorder %v4535_v51, 0.0  ;;  %v3841_v38 = vmul.f32 0.1, %v3608_v61  ;;  %v3888_v55 = vsel %vm1567_vm13, %v3529_v17, %v1631_v53 }
 0x2b7   :  { %v3844_v41 = vmul.f32 0.1, %v3611_v63  ;;  %4548 = vst [vmem:[#allocation42_spill] sm:$0xff] %v3852_v9  ;;  %vm1582_vm10 = vcmp.ge.f32.partialorder %v3589_v60, 0.0  ;;  %v3859_v29 = vmul.f32 0.1, %v3617_v12  ;;  %v3907_v17 = vsel %vm1568_vm14, %v3533_v21, %v3737_v11 }
 0x2b8   :  { %4545 = vst [vmem:[#allocation13_spill] sm:$0xff] %v3829_v44  ;;  %v3847_v44 = vmul.f32 0.1, %v3614_v6  ;;  %v3862_v36 = vmul.f32 0.1, %v3620_v23  ;;  %4550 = vst [vmem:[#allocation44_spill] sm:$0xff] %v3870_v0  ;;  %v3926_v21 = vsel %vm1569_vm15, %v3537_v35, %v3746_v3  ;;  %v3945_v35 = vsel %vm1570_vm0, %v3541_v1, %v3749_v24 }
 0x2b9   :  { %vm1586_vm11 = vcmp.ge.f32.partialorder %v3605_v33, 0.0  ;;  %v3877_v20 = vmul.f32 0.1, %v3626_v25  ;;  %v3880_v9 = vmul.f32 0.1, %v3629_v31  ;;  %4552 = vst [vmem:[#allocation46_spill] sm:$0xff] %v3888_v55  ;;  %v3958_v1 = vsel %vm1571_vm1, %v3545_v43, %v3752_v45 }
 0x2ba   :  { %4547 = vst [vmem:[#allocation41_spill] sm:$0xff] %v3847_v44  ;;  %v3865_v44 = vmul.f32 0.1, %v3623_v28  ;;  %vm1590_vm12 = vcmp.ge.f32.partialorder %v3617_v12, 0.0  ;;  %v3895_v8 = vmul.f32 0.1, %v3635_v50 }
 0x2bb   :  { %v3898_v0 = vmul.f32 0.1, %v3638_v40  ;;  %4554 = vst [vmem:[#allocation48_spill] sm:$0xff] %v3907_v17  ;;  %vm1594_vm13 = vcmp.ge.f32.partialorder %v3629_v31, 0.0  ;;  %v3914_v53 = vmul.f32 0.1, %v3644_v49 }
 0x2bc   :  { %4549 = vst [vmem:[#allocation43_spill] sm:$0xff] %v3865_v44  ;;  %v3883_v44 = vmul.f32 0.1, %v3632_v14  ;;  %v3917_v55 = vmul.f32 0.1, %v3647_v16  ;;  %4556 = vst [vmem:[#allocation50_spill] sm:$0xff] %v3926_v21 }
 0x2bd   :  { %vm1598_vm14 = vcmp.ge.f32.partialorder %v3641_v39, 0.0  ;;  %v3933_v11 = vmul.f32 0.1, %v3653_v18  ;;  %v3936_v17 = vmul.f32 0.1, %v3656_v22  ;;  %4560 = vst [vmem:[#allocation54_spill] sm:$0xff] %v3945_v35 }
 0x2be   :  { %4551 = vst [vmem:[#allocation45_spill] sm:$0xff] %v3883_v44  ;;  %v3901_v44 = vmul.f32 0.1, %v3641_v39  ;;  %vm1602_vm15 = vcmp.ge.f32.partialorder %v3653_v18, 0.0  ;;  %v1669_v3 = vmul.f32 0.1, %v3662_v32 }
 0x2bf   :  { %4557 = vst [vmem:[#allocation51_spill] sm:$0xff] %v3933_v11  ;;  %4558 = vst [vmem:[#allocation52_spill] sm:$0xff] %v3936_v17  ;;  %v1670_v21 = vmul.f32 0.1, %v3665_v37  ;;  %vm1606_vm0 = vcmp.ge.f32.partialorder %v3665_v37, 0.0  ;;  %v4563_v22 = vld [vmem:[#allocation6_spill] sm:$0xff] }
 0x2c0   :  { %4553 = vst [vmem:[#allocation47_spill] sm:$0xff] %v3901_v44  ;;  %v3920_v44 = vmul.f32 0.1, %v3650_v5  ;;  %4561 = vst [vmem:[#allocation55_spill] sm:$0xff] %v3958_v1  ;;  %v1672_v24 = vmul.f32 0.1, %v3671_v47 }
 0x2c1   :  { %v1673_v35 = vmul.f32 0.1, %v3674_v52  ;;  %v1674_v32 = vmul.f32 0.1, %v3677_v57  ;;  %vm1610_vm1 = vcmp.ge.f32.partialorder %v3677_v57, 0.0  ;;  %v4565_v45 = vld [vmem:[#allocation23_spill] sm:$0xff] }
 0x2c2   :  { %4555 = vst [vmem:[#allocation49_spill] sm:$0xff] %v3920_v44  ;;  %v3939_v44 = vmul.f32 0.1, %v3659_v27  ;;  %v4562_v27 = vld [vmem:[#allocation21_spill] sm:$0xff]  ;;  %v1675_v47 = vmul.f32 0.1, %v4565_v45 }
 0x2c3   :  { %v3971_v43 = vsel %vm1572_vm2, %v4563_v22, %v4562_v27  ;;  %v4566_v1 = vld [vmem:[#allocation25_spill] sm:$0xff]  ;;  %v4573_v18 = vld [vmem:[#allocation28_spill] sm:$0xff]  ;;  %v4574_v11 = vld [vmem:[#allocation35_spill] sm:$0xff]  ;;  %vm4579_vm6 = vcmp.ge.f32.partialorder %v4532_v13, 0.0 }
 0x2c4   :  { %4559 = vst [vmem:[#allocation53_spill] sm:$0xff] %v3939_v44  ;;  %v1671_v44 = vmul.f32 0.1, %v3668_v42  ;;  %4564 = vst [vmem:[#allocation21_spill] sm:$0xff] %v3971_v43  ;;  %v4567_v42 = vld [vmem:[#allocation27_spill] sm:$0xff]  ;;  %v4568_v17 = vld [vmem:[#allocation5_spill] sm:$0xff] }
 0x2c5   :  { %v1676_v52 = vmul.f32 0.1, %v4566_v1  ;;  %v1677_v37 = vmul.f32 0.1, %v4567_v42  ;;  %v3984_v22 = vsel %vm1573_vm3, %v3553_v46, %v4568_v17  ;;  %v4570_v27 = vld [vmem:[#allocation29_spill] sm:$0xff]  ;;  %v4571_v43 = vld [vmem:[#allocation31_spill] sm:$0xff]  ;;  %v3997_v46 = vsel %vm1574_vm4, %v3557_v56, %v4574_v11 }
 0x2c6   :  { %4569 = vst [vmem:[#allocation6_spill] sm:$0xff] %v3984_v22  ;;  %vm1614_vm2 = vcmp.ge.f32.partialorder %v4570_v27, 0.0  ;;  %vm1615_vm9 = vcmp.ge.f32.partialorder %v4571_v43, 0.0  ;;  %v4572_v57 = vld [vmem:[#allocation33_spill] sm:$0xff]  ;;  %v1678_v45 = vmul.f32 0.1, %v4570_v27 }
 0x2c7   :  { %vm1616_vm7 = vcmp.ge.f32.partialorder %v4572_v57, 0.0  ;;  %v1679_v1 = vmul.f32 0.1, %v4571_v43  ;;  %v1680_v42 = vmul.f32 0.1, %v4572_v57  ;;  %4575 = vst [vmem:[#allocation5_spill] sm:$0xff] %v3997_v46 }
 0x2c8   :  { %v1681_v17 = vmul.f32 0.1, %v4573_v18  ;;  %v4576_v22 = vld [vmem:[#allocation37_spill] sm:$0xff]  ;;  %vm4577_vm3 = vcmp.ge.f32.partialorder %v3565_v7, 0.0  ;;  %v4578_v57 = vld [vmem:[#allocation7_spill] sm:$0xff]  ;;  %v4580_v11 = vld [vmem:[#allocation8_spill] sm:$0xff] }
 0x2c9   :  { %v4004_v5 = vsel %vm1575_vm5, %v3561_v2, %v4576_v22  ;;  %v4010_v43 = vsel %vm4577_vm3, %v3565_v7, %v3779_v34  ;;  %v4016_v56 = vsel %vm4579_vm6, %v4532_v13, %v4578_v57  ;;  %v4022_v46 = vsel %vm1578_vm8, %v4535_v51, %v4580_v11  ;;  %v4582_v7 = vld [vmem:[#allocation9_spill] sm:$0xff]  ;;  %v4585_v13 = vld [vmem:[#allocation11_spill] sm:$0xff]  ;;  %v4618_v22 = vld [vmem:[#allocation24_spill] sm:$0xff] }
 0x2ca   :  { %vm4581_vm4 = vcmp.ge.f32.partialorder %v4537_v62, 0.0  ;;  %vm4583_vm5 = vcmp.ge.f32.partialorder %v4538_v19, 0.0  ;;  %vm4584_vm6 = vcmp.ge.f32.partialorder %v4541_v10, 0.0  ;;  %v4046_v51 = vsel %vm1582_vm10, %v3589_v60, %v4585_v13  ;;  %v4589_v60 = vld [vmem:[#allocation13_spill] sm:$0xff] }
 0x2cb   :  { %v4028_v2 = vsel %vm4581_vm4, %v4537_v62, %v3794_v54  ;;  %v4034_v34 = vsel %vm4583_vm5, %v4538_v19, %v4582_v7  ;;  %v4040_v57 = vsel %vm4584_vm6, %v4541_v10, %v3806_v48  ;;  %vm4586_vm8 = vcmp.ge.f32.partialorder %v3593_v58, 0.0  ;;  %v4619_v7 = vld [vmem:[#allocation26_spill] sm:$0xff] }
 0x2cc   :  { %v4052_v62 = vsel %vm4586_vm8, %v3593_v58, %v3812_v15  ;;  %vm4587_vm3 = vcmp.ge.f32.partialorder %v4544_v26, 0.0  ;;  %vm4588_vm4 = vcmp.ge.f32.partialorder %v3601_v59, 0.0  ;;  %v4070_v10 = vsel %vm1586_vm11, %v3605_v33, %v4589_v60  ;;  %v4621_v60 = vld [vmem:[#allocation12_spill] sm:$0xff] }
 0x2cd   :  { %v4058_v54 = vsel %vm4587_vm3, %v4544_v26, %v3823_v30  ;;  %v4064_v19 = vsel %vm4588_vm4, %v3601_v59, %v3826_v4  ;;  %vm4590_vm10 = vcmp.ge.f32.partialorder %v3608_v61, 0.0  ;;  %vm4591_vm5 = vcmp.ge.f32.partialorder %v3611_v63, 0.0  ;;  %v4592_v59 = vld [vmem:[#allocation41_spill] sm:$0xff]  ;;  %v4606_v30 = vld [vmem:[#allocation15_spill] sm:$0xff] }
 0x2ce   :  { %v4076_v58 = vsel %vm4590_vm10, %v3608_v61, %v3841_v38  ;;  %v4082_v15 = vsel %vm4591_vm5, %v3611_v63, %v3844_v41  ;;  %vm4593_vm6 = vcmp.ge.f32.partialorder %v3614_v6, 0.0  ;;  %v4094_v33 = vsel %vm1590_vm12, %v3617_v12, %v3859_v29  ;;  %v4595_v41 = vld [vmem:[#allocation43_spill] sm:$0xff]  ;;  %v4609_v38 = vld [vmem:[#allocation17_spill] sm:$0xff]  ;;  %v4611_v29 = vld [vmem:[#allocation18_spill] sm:$0xff] }
 0x2cf   :  { %v4088_v4 = vsel %vm4593_vm6, %v3614_v6, %v4592_v59  ;;  %vm4594_vm11 = vcmp.ge.f32.partialorder %v3620_v23, 0.0  ;;  %vm4596_vm8 = vcmp.ge.f32.partialorder %v3623_v28, 0.0  ;;  %vm4597_vm3 = vcmp.ge.f32.partialorder %v3626_v25, 0.0 }
 0x2d0   :  { %v4100_v61 = vsel %vm4594_vm11, %v3620_v23, %v3862_v36  ;;  %v4106_v63 = vsel %vm4596_vm8, %v3623_v28, %v4595_v41  ;;  %v4112_v6 = vsel %vm4597_vm3, %v3626_v25, %v3877_v20  ;;  %v4118_v12 = vsel %vm1594_vm13, %v3629_v31, %v3880_v9  ;;  %v4598_v23 = vld [vmem:[#allocation45_spill] sm:$0xff]  ;;  %v4602_v31 = vld [vmem:[#allocation47_spill] sm:$0xff]  ;;  %v4614_v20 = vld [vmem:[#allocation20_spill] sm:$0xff] }
 0x2d1   :  { %vm4599_vm12 = vcmp.ge.f32.partialorder %v3632_v14, 0.0  ;;  %vm4600_vm4 = vcmp.ge.f32.partialorder %v3635_v50, 0.0  ;;  %vm4601_vm10 = vcmp.ge.f32.partialorder %v3638_v40, 0.0  ;;  %v4142_v26 = vsel %vm1598_vm14, %v3641_v39, %v4602_v31  ;;  %v4608_v39 = vld [vmem:[#allocation51_spill] sm:$0xff]  ;;  %v4623_v41 = vld [vmem:[#allocation14_spill] sm:$0xff] }
 0x2d2   :  { %v4124_v48 = vsel %vm4599_vm12, %v3632_v14, %v4598_v23  ;;  %v4130_v28 = vsel %vm4600_vm4, %v3635_v50, %v3895_v8  ;;  %v4136_v25 = vsel %vm4601_vm10, %v3638_v40, %v3898_v0  ;;  %vm4603_vm13 = vcmp.ge.f32.partialorder %v3644_v49, 0.0  ;;  %v4605_v40 = vld [vmem:[#allocation49_spill] sm:$0xff]  ;;  %v4616_v8 = vld [vmem:[#allocation22_spill] sm:$0xff]  ;;  %v4625_v23 = vld [vmem:[#allocation16_spill] sm:$0xff] }
 0x2d3   :  { %v4148_v14 = vsel %vm4603_vm13, %v3644_v49, %v3914_v53  ;;  %vm4604_vm5 = vcmp.ge.f32.partialorder %v3647_v16, 0.0  ;;  %vm4607_vm6 = vcmp.ge.f32.partialorder %v4606_v30, 0.0  ;;  %v4166_v9 = vsel %vm1602_vm15, %v4609_v38, %v4608_v39  ;;  %v4610_v49 = vld [vmem:[#allocation52_spill] sm:$0xff]  ;;  %v4626_v31 = vld [vmem:[#allocation23_spill] sm:$0xff]  ;;  %v4633_v38 = vld [vmem:[#allocation33_spill] sm:$0xff] }
 0x2d4   :  { %v4154_v50 = vsel %vm4604_vm5, %v3647_v16, %v3917_v55  ;;  %v4160_v36 = vsel %vm4607_vm6, %v4606_v30, %v4605_v40  ;;  %vm4612_vm14 = vcmp.ge.f32.partialorder %v4611_v29, 0.0  ;;  %v4613_v16 = vld [vmem:[#allocation53_spill] sm:$0xff]  ;;  %vm4615_vm11 = vcmp.ge.f32.partialorder %v4614_v20, 0.0  ;;  %v4630_v30 = vld [vmem:[#allocation27_spill] sm:$0xff] }
 0x2d5   :  { %v4172_v0 = vsel %vm4612_vm14, %v4611_v29, %v4610_v49  ;;  %v4178_v55 = vsel %vm4615_vm11, %v4614_v20, %v4613_v16  ;;  %vm4617_vm8 = vcmp.ge.f32.partialorder %v4616_v8, 0.0  ;;  %v4188_v11 = vsel %vm1606_vm0, %v4618_v22, %v1670_v21  ;;  %v4628_v40 = vld [vmem:[#allocation25_spill] sm:$0xff]  ;;  %v4632_v39 = vld [vmem:[#allocation31_spill] sm:$0xff]  ;;  %v4636_v49 = vld [vmem:[#allocation30_spill] sm:$0xff] }
 0x2d6   :  { %v4183_v53 = vsel %vm4617_vm8, %v4616_v8, %v1669_v3  ;;  %vm4620_vm15 = vcmp.ge.f32.partialorder %v4619_v7, 0.0  ;;  %vm4622_vm3 = vcmp.ge.f32.partialorder %v4621_v60, 0.0  ;;  %vm4624_vm12 = vcmp.ge.f32.partialorder %v4623_v41, 0.0  ;;  %v4637_v29 = vld [vmem:[#allocation32_spill] sm:$0xff]  ;;  %v4641_v22 = vld [vmem:[#allocation38_spill] sm:$0xff] }
 0x2d7   :  { %v4193_v13 = vsel %vm4620_vm15, %v4619_v7, %v1671_v44  ;;  %v4198_v59 = vsel %vm4622_vm3, %v4621_v60, %v1672_v24  ;;  %v4203_v3 = vsel %vm4624_vm12, %v4623_v41, %v1673_v35  ;;  %v4208_v21 = vsel %vm1610_vm1, %v4625_v23, %v1674_v32  ;;  %v4640_v8 = vld [vmem:[#allocation36_spill] sm:$0xff]  ;;  %v4642_v7 = vld [vmem:[#allocation10_spill] sm:$0xff]  ;;  %v4643_v60 = vld [vmem:[#allocation39_spill] sm:$0xff] }
 0x2d8   :  { %vm4627_vm0 = vcmp.ge.f32.partialorder %v4626_v31, 0.0  ;;  %vm4629_vm4 = vcmp.ge.f32.partialorder %v4628_v40, 0.0  ;;  %vm4631_vm10 = vcmp.ge.f32.partialorder %v4630_v30, 0.0  ;;  %v4228_v32 = vsel %vm1614_vm2, %v4570_v27, %v1678_v45  ;;  %v4638_v45 = vld [vmem:[#allocation34_spill] sm:$0xff]  ;;  %v4639_v27 = vld [vmem:[#allocation19_spill] sm:$0xff]  ;;  %v4644_v23 = vld [vmem:[#allocation40_spill] sm:$0xff] }
 0x2d9   :  { %v4213_v44 = vsel %vm4627_vm0, %v4626_v31, %v1675_v47  ;;  %v4218_v24 = vsel %vm4629_vm4, %v4628_v40, %v1676_v52  ;;  %v4223_v35 = vsel %vm4631_vm10, %v4630_v30, %v1677_v37  ;;  %v4233_v47 = vsel %vm1615_vm9, %v4632_v39, %v1679_v1  ;;  %v4646_v40 = vld [vmem:[#allocation44_spill] sm:$0xff]  ;;  %v4647_v30 = vld [vmem:[#allocation46_spill] sm:$0xff] }
 0x2da   :  { %v4238_v52 = vsel %vm1616_vm7, %v4633_v38, %v1680_v42  ;;  %vm4634_vm1 = vcmp.ge.f32.partialorder %v4573_v18, 0.0  ;;  %v2295_v16 = vpack.c.bf16 %v4637_v29, %v4636_v49  ;;  %v2300_v20 = vpack.c.bf16 %v4639_v27, %v4638_v45  ;;  %v4645_v42 = vld [vmem:[#allocation42_spill] sm:$0xff]  ;;  %v4651_v49 = vld [vmem:[#allocation55_spill] sm:$0xff]  ;;  %v4652_v45 = vld [vmem:[#allocation21_spill] sm:$0xff] }
 0x2db   :  { %v4243_v37 = vsel %vm4634_vm1, %v4573_v18, %v1681_v17  ;;  %v2305_v1 = vpack.c.bf16 %v4641_v22, %v4640_v8  ;;  %v2310_v41 = vpack.c.bf16 %v4643_v60, %v4642_v7  ;;  %v2315_v31 = vpack.c.bf16 %v4645_v42, %v4644_v23  ;;  %v4648_v18 = vld [vmem:[#allocation48_spill] sm:$0xff]  ;;  %v4649_v17 = vld [vmem:[#allocation50_spill] sm:$0xff]  ;;  %v4654_v22 = vld [vmem:[#allocation5_spill] sm:$0xff] }
 0x2dc   :  { %4635 = vst [vmem:[#allocation29_spill] sm:$0xff] %v4243_v37  ;;  %v2320_v39 = vpack.c.bf16 %v4647_v30, %v4646_v40  ;;  %v2325_v38 = vpack.c.bf16 %v4649_v17, %v4648_v18  ;;  %v4650_v37 = vld [vmem:[#allocation54_spill] sm:$0xff]  ;;  %2296 = vst [vmem:[#allocation2] sm:$0xff] %v2295_v16   ;;  %v2340_v7 = vpack.c.bf16 %v4004_v5, %v4654_v22 }
 0x2dd   :  { %v2330_v29 = vpack.c.bf16 %v4651_v49, %v4650_v37  ;;  %2452 = vst [vmem:[#allocation2 + $0x8] sm:$0xff] %v2300_v20   ;;  %2453 = vst [vmem:[#allocation2 + $0x10] sm:$0xff] %v2305_v1   ;;  %v4653_v27 = vld [vmem:[#allocation6_spill] sm:$0xff]  ;;  %v2345_v60 = vpack.c.bf16 %v4016_v56, %v4010_v43  ;;  %v2350_v23 = vpack.c.bf16 %v4028_v2, %v4022_v46 }
 0x2de   :  { %2454 = vst [vmem:[#allocation2 + $0x18] sm:$0xff] %v2310_v41   ;;  %v2335_v8 = vpack.c.bf16 %v4653_v27, %v4652_v45  ;;  %2455 = vst [vmem:[#allocation2 + $0x20] sm:$0xff] %v2315_v31   ;;  %v2355_v37 = vpack.c.bf16 %v4040_v57, %v4034_v34  ;;  %v2360_v16 = vpack.c.bf16 %v4052_v62, %v4046_v51 }
 0x2df   :  { %2456 = vst [vmem:[#allocation2 + $0x28] sm:$0xff] %v2320_v39   ;;  %2457 = vst [vmem:[#allocation2 + $0x30] sm:$0xff] %v2325_v38   ;;  %v2365_v20 = vpack.c.bf16 %v4064_v19, %v4058_v54  ;;  %v2370_v5 = vpack.c.bf16 %v4076_v58, %v4070_v10  ;;  %v2375_v43 = vpack.c.bf16 %v4088_v4, %v4082_v15 }
 0x2e0   :  { %2458 = vst [vmem:[#allocation2 + $0x38] sm:$0xff] %v2330_v29   ;;  %2459 = vst [vmem:[#allocation2 + $0x40] sm:$0xff] %v2335_v8   ;;  %v2380_v46 = vpack.c.bf16 %v4100_v61, %v4094_v33  ;;  %v2385_v56 = vpack.c.bf16 %v4112_v6, %v4106_v63  ;;  %v2390_v2 = vpack.c.bf16 %v4124_v48, %v4118_v12 }
 0x2e1   :  { %2460 = vst [vmem:[#allocation2 + $0x48] sm:$0xff] %v2340_v7   ;;  %2461 = vst [vmem:[#allocation2 + $0x50] sm:$0xff] %v2345_v60   ;;  %v2395_v34 = vpack.c.bf16 %v4136_v25, %v4130_v28  ;;  %v2400_v57 = vpack.c.bf16 %v4148_v14, %v4142_v26  ;;  %v2405_v51 = vpack.c.bf16 %v4160_v36, %v4154_v50 }
 0x2e2   :  { %2462 = vst [vmem:[#allocation2 + $0x58] sm:$0xff] %v2350_v23   ;;  %2463 = vst [vmem:[#allocation2 + $0x60] sm:$0xff] %v2355_v37   ;;  %v2410_v62 = vpack.c.bf16 %v4172_v0, %v4166_v9  ;;  %v2415_v54 = vpack.c.bf16 %v4183_v53, %v4178_v55  ;;  %v2420_v19 = vpack.c.bf16 %v4193_v13, %v4188_v11 }
 0x2e3   :  { %2464 = vst [vmem:[#allocation2 + $0x68] sm:$0xff] %v2360_v16   ;;  %2465 = vst [vmem:[#allocation2 + $0x70] sm:$0xff] %v2365_v20   ;;  %v2425_v10 = vpack.c.bf16 %v4203_v3, %v4198_v59  ;;  %v2430_v58 = vpack.c.bf16 %v4213_v44, %v4208_v21  ;;  %v2435_v15 = vpack.c.bf16 %v4223_v35, %v4218_v24  ;;  %v4655_v33 = vld [vmem:[#allocation29_spill] sm:$0xff] }
 0x2e4   :  { %2466 = vst [vmem:[#allocation2 + $0x78] sm:$0xff] %v2370_v5   ;;  %2467 = vst [vmem:[#allocation2 + $0x80] sm:$0xff] %v2375_v43   ;;  %v2440_v4 = vpack.c.bf16 %v4233_v47, %v4228_v32  ;;  %v2445_v61 = vpack.c.bf16 %v4655_v33, %v4238_v52 }
 0x2e5   :  { %2468 = vst [vmem:[#allocation2 + $0x88] sm:$0xff] %v2380_v46   ;;  %2469 = vst [vmem:[#allocation2 + $0x90] sm:$0xff] %v2385_v56  }
 0x2e6   :  { %2470 = vst [vmem:[#allocation2 + $0x98] sm:$0xff] %v2390_v2   ;;  %2471 = vst [vmem:[#allocation2 + $0xa0] sm:$0xff] %v2395_v34  }
 0x2e7   :  { %2472 = vst [vmem:[#allocation2 + $0xa8] sm:$0xff] %v2400_v57   ;;  %2473 = vst [vmem:[#allocation2 + $0xb0] sm:$0xff] %v2405_v51  }
 0x2e8   :  { %2474 = vst [vmem:[#allocation2 + $0xb8] sm:$0xff] %v2410_v62   ;;  %2475 = vst [vmem:[#allocation2 + $0xc0] sm:$0xff] %v2415_v54  }
 0x2e9   :  { %2476 = vst [vmem:[#allocation2 + $0xc8] sm:$0xff] %v2420_v19   ;;  %2477 = vst [vmem:[#allocation2 + $0xd0] sm:$0xff] %v2425_v10  }
 0x2ea   :  { %2478 = vst [vmem:[#allocation2 + $0xd8] sm:$0xff] %v2430_v58   ;;  %2479 = vst [vmem:[#allocation2 + $0xe0] sm:$0xff] %v2435_v15  }
 0x2eb   :  { %2480 = vst [vmem:[#allocation2 + $0xe8] sm:$0xff] %v2440_v4   ;;  %2481 = vst [vmem:[#allocation2 + $0xf0] sm:$0xff] %v2445_v61  }
 0x2ec   :  { %2644 = shalt.err (!%p2641_p4)
}
 0x2ed   :  { %s2645_s20 = scalar_lea.hbm %s4330_s4, 4096 }
 0x2ee   :  { %p2646_p5 = scmp.ne.s32.totalorder %s4330_s4, %s2645_s20  ;;  %p2649_p6 = scmp.lt.u32.totalorder %s2645_s20, %s4330_s4 }
 0x2f0   :  { %p2651_p7 = pnand %p2649_p6, %p2646_p5 }
 0x2f2   :  { %2654 = shalt.err (!%p2651_p7)
}
 0x2f3   :  { %s2659_s25 = smov 64   ;;  %s2660_s26 = smov 4  }
 0x2f4   :  { %2079 = dma.vmem_to_hbm [thread:$0]  %s4301_s3, 4096, %s4330_s4, [#allocation3], %s2659_s25, %s2659_s25, %s2660_s26  }
 0x2f5   :  { %2655 = dma.done.wait [#allocation3], 4096  }
 0x2f6   :  { %2656 = vsyncadd [#allocation3], 4294963200 }
 0x2f7   :  { %2083 = vsyncpa [#allocation3], 1 }

</bundles_post_ra>
